<compile_context>
chip_gen: v7x
topology: tpu7x:2x2x1
jax: 0.10.0
libtpu: 0.0.40
codegen_flags: <defaults>
</compile_context>

<pallas_src>
import jax
import jax.numpy as jnp
from jax.experimental import pallas as pl
from jax.experimental.pallas import tpu as pltpu

EPS = 1e-5
KH = 3  # 3x3 conv, padding=1 (fixed by the module)


def _skip_bn_kernel(x_ref, wb1_ref, g1_ref, bt1_ref, wb2_ref, g2_ref, bt2_ref,
                    sel_ref, selt_ref, out_ref, a1_scr, a2_scr):
    N, H, WCin = x_ref.shape
    WCout = out_ref.shape[-1]
    Cout = sel_ref.shape[-1]
    W = WCout // Cout
    Cin = WCin // W
    M = N * H * W
    inv_m = 1.0 / M

    def stage_rows(a_scr, x_val, C):
        """a_scr[n, h, dy*R + s*C + c] = zero-padded input row (h + dy):
        the three padded rows a 3x3 conv needs for output row h, laid side by side.
        Only the pad border is zeroed; the interior is written once."""
        R = (W + 2) * C
        zcol = jnp.zeros((N, H, C), jnp.float32)
        zrow = jnp.zeros((N, 1, W * C), jnp.float32)
        for dy in range(KH):
            base = dy * R
            a_scr[:, :, base:base + C] = zcol                            # left pad column
            a_scr[:, :, base + (W + 1) * C:base + (W + 2) * C] = zcol    # right pad column
        # dy = 0: padded row h -> source row h-1 (row 0 of the pad is zeros)
        a_scr[:, 0:1, C:(W + 1) * C] = zrow
        a_scr[:, 1:H, C:(W + 1) * C] = x_val[:, 0:H - 1, :]
        # dy = 1: padded row h+1 -> source row h (always valid)
        a_scr[:, :, R + C:R + (W + 1) * C] = x_val
        # dy = 2: padded row h+2 -> source row h+1 (last row of the pad is zeros)
        a_scr[:, 0:H - 1, 2 * R + C:2 * R + (W + 1) * C] = x_val[:, 1:H, :]
        a_scr[:, H - 1:H, 2 * R + C:2 * R + (W + 1) * C] = zrow

    def conv_bn_relu(a_scr, wb_ref, g_ref, bt_ref):
        # one lane-dense matmul per layer: (N*H, 3*(W+2)*C) @ (3*(W+2)*C, W*Cout)
        a = a_scr[...].reshape(N * H, a_scr.shape[-1]).astype(jnp.bfloat16)
        acc = jnp.dot(a, wb_ref[...], preferred_element_type=jnp.float32)   # (N*H, W*Cout)
        # training-mode BN: biased batch stats over (N, H, W), single pass.
        raw = jnp.concatenate([jnp.sum(acc, axis=0, keepdims=True),
                               jnp.sum(acc * acc, axis=0, keepdims=True)], axis=0)  # (2, W*Cout)
        ch = jnp.dot(raw, sel_ref[...], preferred_element_type=jnp.float32) * inv_m  # (2, Cout)
        mu = ch[0:1, :]
        var = jnp.maximum(ch[1:2, :] - mu * mu, 0.0)       # clamp one-pass variance
        scale = g_ref[...] * jax.lax.rsqrt(var + EPS)      # fold BN into one FMA
        shift = bt_ref[...] - mu * scale
        ssl = jnp.dot(jnp.concatenate([scale, shift], axis=0), selt_ref[...],
                      preferred_element_type=jnp.float32)  # tile per-channel params onto lanes
        return jnp.maximum(acc * ssl[0:1, :] + ssl[1:2, :], 0.0)

    stage_rows(a1_scr, x_ref[...], Cin)
    x2 = conv_bn_relu(a1_scr, wb1_ref, g1_ref, bt1_ref)            # (N*H, W*Cout), lane-dense
    stage_rows(a2_scr, x2.reshape(N, H, WCout), Cout)
    x3 = conv_bn_relu(a2_scr, wb2_ref, g2_ref, bt2_ref)
    out_ref[...] = (x2 + x3).reshape(N, H, WCout).astype(out_ref.dtype)


def _band_weights(w_hwio, W):
    """(3,3,C,Cout) HWIO conv weight -> banded matrix B, shape (3*(W+2)*C, W*Cout), with
    B[dy*(W+2)*C + s*C + ci, w*Cout + co] = w[dy, s-w, ci, co] inside the band, else 0,
    so that (3 padded rows laid side by side) @ B == conv2d(pad=1) for one output row."""
    KH_, KW_, C, Cout = w_hwio.shape
    Wp = W + KW_ - 1
    dx = jnp.arange(Wp)[:, None] - jnp.arange(W)[None, :]          # (Wp, W) = s - w
    taps = w_hwio[:, jnp.clip(dx, 0, KW_ - 1), :, :]               # (KH, Wp, W, C, Cout)
    taps = jnp.where(((dx >= 0) & (dx < KW_))[None, :, :, None, None], taps, 0.0)
    return jnp.transpose(taps, (0, 1, 3, 2, 4)).reshape(KH_ * Wp * C, W * Cout)


@jax.jit
def skip_bn_block(x_nchw, w1, b1, g1, bt1, w2, b2, g2, bt2):
    """NCHW in / NCHW out.  b1/b2 (conv biases) are accepted for API parity but unused:
    a bias added right before training-mode BatchNorm is cancelled by the mean subtraction."""
    del b1, b2
    N, Cin, H, W = x_nchw.shape
    Cout = w1.shape[-1]
    # NCHW -> (N, H, W*Cin): one fused XLA transpose+reshape; padding happens in-kernel.
    x_rows = jnp.transpose(x_nchw, (0, 2, 3, 1)).reshape(N, H, W * Cin).astype(jnp.float32)

    wb1 = _band_weights(w1.astype(jnp.float32), W).astype(jnp.bfloat16)   # (3*(W+2)*Cin,  W*Cout)
    wb2 = _band_weights(w2.astype(jnp.float32), W).astype(jnp.bfloat16)   # (3*(W+2)*Cout, W*Cout)
    sel = jnp.tile(jnp.eye(Cout, dtype=jnp.float32), (W, 1))              # (W*Cout, Cout)
    selt = jnp.transpose(sel)                                             # (Cout, W*Cout)
    p2d = lambda p: p.reshape(1, -1).astype(jnp.float32)

    out_rows = pl.pallas_call(
        _skip_bn_kernel,
        out_shape=jax.ShapeDtypeStruct((N, H, W * Cout), jnp.float32),
        in_specs=[pl.BlockSpec(memory_space=pltpu.MemorySpace.VMEM)] * 9,
        out_specs=pl.BlockSpec(memory_space=pltpu.MemorySpace.VMEM),
        scratch_shapes=[pltpu.VMEM((N, H, 3 * (W + 2) * Cin), jnp.float32),
                        pltpu.VMEM((N, H, 3 * (W + 2) * Cout), jnp.float32)],
        compiler_params=pltpu.CompilerParams(vmem_limit_bytes=32 * 1024 * 1024),
    )(x_rows, wb1, p2d(g1), p2d(bt1), wb2, p2d(g2), p2d(bt2), sel, selt)

    return jnp.transpose(out_rows.reshape(N, H, W, Cout), (0, 3, 1, 2))


# -------------------- pure-JAX reference (golden, f32) --------------------
def _conv_bn_relu_ref(x, w_hwio, b, g, be):
    w_oihw = jnp.transpose(w_hwio, (3, 2, 0, 1))
    y = jax.lax.conv_general_dilated(
        x, w_oihw, window_strides=(1, 1), padding=((1, 1), (1, 1)),
        dimension_numbers=('NCHW', 'OIHW', 'NCHW'),
        precision=jax.lax.Precision.HIGHEST)
    y = y + b[None, :, None, None]
    mu = jnp.mean(y, axis=(0, 2, 3), keepdims=True)
    var = jnp.mean((y - mu) ** 2, axis=(0, 2, 3), keepdims=True)
    y = (y - mu) * jax.lax.rsqrt(var + EPS) * g[None, :, None, None] + be[None, :, None, None]
    return jnp.maximum(y, 0.0)


def ref_forward(x, params):
    w1, b1, g1, bt1, w2, b2, g2, bt2 = params
    x2 = _conv_bn_relu_ref(x, w1, b1, g1, bt1)
    x3 = _conv_bn_relu_ref(x2, w2, b2, g2, bt2)
    return x2 + x3


if __name__ == "__main__":
    key = jax.random.PRNGKey(0)
    N, Cin, Cout, H, W = 2, 4, 8, 16, 16
    ks = jax.random.split(key, 9)

    x = jax.random.normal(ks[0], (N, Cin, H, W), jnp.float32)
    # HWIO conv weights + per-channel BN affine (deterministic synthetic params).
    w1 = 0.2 * jax.random.normal(ks[1], (3, 3, Cin, Cout), jnp.float32)
    b1 = 0.1 * jax.random.normal(ks[2], (Cout,), jnp.float32)
    g1 = 1.0 + 0.1 * jax.random.normal(ks[3], (Cout,), jnp.float32)
    bt1 = 0.1 * jax.random.normal(ks[4], (Cout,), jnp.float32)
    w2 = 0.2 * jax.random.normal(ks[5], (3, 3, Cout, Cout), jnp.float32)
    b2 = 0.1 * jax.random.normal(ks[6], (Cout,), jnp.float32)
    g2 = 1.0 + 0.1 * jax.random.normal(ks[7], (Cout,), jnp.float32)
    bt2 = 0.1 * jax.random.normal(ks[8], (Cout,), jnp.float32)

    out = jax.block_until_ready(skip_bn_block(x, w1, b1, g1, bt1, w2, b2, g2, bt2))

    ref = ref_forward(x, (w1, b1, g1, bt1, w2, b2, g2, bt2))
    assert out.shape == (N, Cout, H, W), out.shape
    max_err = float(jnp.max(jnp.abs(out - ref)))
    # Kernel matmuls run as a single bf16 MXU pass (f32 accumulation) vs an f32 reference.
    assert bool(jnp.allclose(out, ref, atol=3e-2, rtol=3e-2)), f"max abs err {max_err}"

    print("KERNEL_OK")
</pallas_src>

<mosaic_0001>
module attributes {stable_mosaic.version = 11 : i64} {
  func.func @_skip_bn_kernel(%arg0: memref<2x16x64xf32, #tpu.memory_space<vmem>>, %arg1: memref<216x128xbf16, #tpu.memory_space<vmem>>, %arg2: memref<1x8xf32, #tpu.memory_space<vmem>>, %arg3: memref<1x8xf32, #tpu.memory_space<vmem>>, %arg4: memref<432x128xbf16, #tpu.memory_space<vmem>>, %arg5: memref<1x8xf32, #tpu.memory_space<vmem>>, %arg6: memref<1x8xf32, #tpu.memory_space<vmem>>, %arg7: memref<128x8xf32, #tpu.memory_space<vmem>>, %arg8: memref<8x128xf32, #tpu.memory_space<vmem>>, %arg9: memref<2x16x128xf32, #tpu.memory_space<vmem>>, %arg10: memref<2x16x216xf32, #tpu.memory_space<vmem>>, %arg11: memref<2x16x432xf32, #tpu.memory_space<vmem>>) attributes {dimension_semantics = [], scalar_prefetch = 0 : i64, scratch_operands = 2 : i64, tpu.core_type = #tpu.core_type<tc>} {
    %c0 = arith.constant 0 : index
    %c0_0 = arith.constant 0 : index
    %c0_1 = arith.constant 0 : index
    %0 = vector.load %arg0[%c0, %c0_0, %c0_1] : memref<2x16x64xf32, #tpu.memory_space<vmem>>, vector<2x16x64xf32>
    %cst = arith.constant 0.000000e+00 : f32
    %1 = vector.broadcast %cst : f32 to vector<2x16x4xf32>
    %cst_2 = arith.constant 0.000000e+00 : f32
    %2 = vector.broadcast %cst_2 : f32 to vector<2x1x64xf32>
    %c0_3 = arith.constant 0 : index
    %c0_4 = arith.constant 0 : index
    %c0_5 = arith.constant 0 : index
    %3 = vector.load %arg10[%c0_3, %c0_4, %c0_5] : memref<2x16x216xf32, #tpu.memory_space<vmem>>, vector<2x16x4xf32>
    tpu.vector_store %arg10[%c0_3, %c0_4, %c0_5], %1 {strides = array<i32>} : memref<2x16x216xf32, #tpu.memory_space<vmem>>, vector<2x16x4xf32>,
    %c0_6 = arith.constant 0 : index
    %c0_7 = arith.constant 0 : index
    %c68 = arith.constant 68 : index
    %4 = vector.load %arg10[%c0_6, %c0_7, %c68] : memref<2x16x216xf32, #tpu.memory_space<vmem>>, vector<2x16x4xf32>
    tpu.vector_store %arg10[%c0_6, %c0_7, %c68], %1 {strides = array<i32>} : memref<2x16x216xf32, #tpu.memory_space<vmem>>, vector<2x16x4xf32>,
    %c0_8 = arith.constant 0 : index
    %c0_9 = arith.constant 0 : index
    %c72 = arith.constant 72 : index
    %5 = vector.load %arg10[%c0_8, %c0_9, %c72] : memref<2x16x216xf32, #tpu.memory_space<vmem>>, vector<2x16x4xf32>
    tpu.vector_store %arg10[%c0_8, %c0_9, %c72], %1 {strides = array<i32>} : memref<2x16x216xf32, #tpu.memory_space<vmem>>, vector<2x16x4xf32>,
    %c0_10 = arith.constant 0 : index
    %c0_11 = arith.constant 0 : index
    %c140 = arith.constant 140 : index
    %6 = vector.load %arg10[%c0_10, %c0_11, %c140] : memref<2x16x216xf32, #tpu.memory_space<vmem>>, vector<2x16x4xf32>
    tpu.vector_store %arg10[%c0_10, %c0_11, %c140], %1 {strides = array<i32>} : memref<2x16x216xf32, #tpu.memory_space<vmem>>, vector<2x16x4xf32>,
    %c0_12 = arith.constant 0 : index
    %c0_13 = arith.constant 0 : index
    %c144 = arith.constant 144 : index
    %7 = vector.load %arg10[%c0_12, %c0_13, %c144] : memref<2x16x216xf32, #tpu.memory_space<vmem>>, vector<2x16x4xf32>
    tpu.vector_store %arg10[%c0_12, %c0_13, %c144], %1 {strides = array<i32>} : memref<2x16x216xf32, #tpu.memory_space<vmem>>, vector<2x16x4xf32>,
    %c0_14 = arith.constant 0 : index
    %c0_15 = arith.constant 0 : index
    %c212 = arith.constant 212 : index
    %8 = vector.load %arg10[%c0_14, %c0_15, %c212] : memref<2x16x216xf32, #tpu.memory_space<vmem>>, vector<2x16x4xf32>
    tpu.vector_store %arg10[%c0_14, %c0_15, %c212], %1 {strides = array<i32>} : memref<2x16x216xf32, #tpu.memory_space<vmem>>, vector<2x16x4xf32>,
    %c0_16 = arith.constant 0 : index
    %c0_17 = arith.constant 0 : index
    %c4 = arith.constant 4 : index
    %9 = vector.load %arg10[%c0_16, %c0_17, %c4] : memref<2x16x216xf32, #tpu.memory_space<vmem>>, vector<2x1x64xf32>
    tpu.vector_store %arg10[%c0_16, %c0_17, %c4], %2 {strides = array<i32>} : memref<2x16x216xf32, #tpu.memory_space<vmem>>, vector<2x1x64xf32>,
    %10 = vector.extract_strided_slice %0 {offsets = [0, 0, 0], sizes = [2, 15, 64], strides = [1, 1, 1]} : vector<2x16x64xf32> to vector<2x15x64xf32>
    %c0_18 = arith.constant 0 : index
    %c1 = arith.constant 1 : index
    %c4_19 = arith.constant 4 : index
    %11 = vector.load %arg10[%c0_18, %c1, %c4_19] : memref<2x16x216xf32, #tpu.memory_space<vmem>>, vector<2x15x64xf32>
    tpu.vector_store %arg10[%c0_18, %c1, %c4_19], %10 {strides = array<i32>} : memref<2x16x216xf32, #tpu.memory_space<vmem>>, vector<2x15x64xf32>,
    %c0_20 = arith.constant 0 : index
    %c0_21 = arith.constant 0 : index
    %c76 = arith.constant 76 : index
    %12 = vector.load %arg10[%c0_20, %c0_21, %c76] : memref<2x16x216xf32, #tpu.memory_space<vmem>>, vector<2x16x64xf32>
    tpu.vector_store %arg10[%c0_20, %c0_21, %c76], %0 {strides = array<i32>} : memref<2x16x216xf32, #tpu.memory_space<vmem>>, vector<2x16x64xf32>,
    %13 = vector.extract_strided_slice %0 {offsets = [0, 1, 0], sizes = [2, 15, 64], strides = [1, 1, 1]} : vector<2x16x64xf32> to vector<2x15x64xf32>
    %c0_22 = arith.constant 0 : index
    %c0_23 = arith.constant 0 : index
    %c148 = arith.constant 148 : index
    %14 = vector.load %arg10[%c0_22, %c0_23, %c148] : memref<2x16x216xf32, #tpu.memory_space<vmem>>, vector<2x15x64xf32>
    tpu.vector_store %arg10[%c0_22, %c0_23, %c148], %13 {strides = array<i32>} : memref<2x16x216xf32, #tpu.memory_space<vmem>>, vector<2x15x64xf32>,
    %c0_24 = arith.constant 0 : index
    %c15 = arith.constant 15 : index
    %c148_25 = arith.constant 148 : index
    %15 = vector.load %arg10[%c0_24, %c15, %c148_25] : memref<2x16x216xf32, #tpu.memory_space<vmem>>, vector<2x1x64xf32>
    tpu.vector_store %arg10[%c0_24, %c15, %c148_25], %2 {strides = array<i32>} : memref<2x16x216xf32, #tpu.memory_space<vmem>>, vector<2x1x64xf32>,
    %c0_26 = arith.constant 0 : index
    %c0_27 = arith.constant 0 : index
    %c0_28 = arith.constant 0 : index
    %16 = vector.load %arg10[%c0_26, %c0_27, %c0_28] : memref<2x16x216xf32, #tpu.memory_space<vmem>>, vector<2x16x216xf32>
    %17 = vector.shape_cast %16 : vector<2x16x216xf32> to vector<32x216xf32>
    %18 = arith.truncf %17 : vector<32x216xf32> to vector<32x216xbf16>
    %c0_29 = arith.constant 0 : index
    %c0_30 = arith.constant 0 : index
    %19 = vector.load %arg1[%c0_29, %c0_30] : memref<216x128xbf16, #tpu.memory_space<vmem>>, vector<216x128xbf16>
    %cst_31 = arith.constant dense<0.000000e+00> : vector<32x128xf32>
    %20 = tpu.matmul %18, %19, %cst_31 {dimension_numbers = #tpu.dot_dimension_numbers<[1], [0], [0], [1], [0, 0, 1, 1], [], []>} : vector<32x216xbf16>, vector<216x128xbf16>, vector<32x128xf32> -> vector<32x128xf32>
    %cst_32 = arith.constant dense<0.000000e+00> : vector<128xf32>
    %21 = vector.multi_reduction <add>, %20, %cst_32 [0] : vector<32x128xf32> to vector<128xf32>
    %22 = vector.shape_cast %21 : vector<128xf32> to vector<1x128xf32>
    %23 = arith.mulf %20, %20 : vector<32x128xf32>
    %cst_33 = arith.constant dense<0.000000e+00> : vector<128xf32>
    %24 = vector.multi_reduction <add>, %23, %cst_33 [0] : vector<32x128xf32> to vector<128xf32>
    %25 = vector.shape_cast %24 : vector<128xf32> to vector<1x128xf32>
    %26 = tpu.concatenate %22, %25 in 0 : vector<1x128xf32>, vector<1x128xf32> -> vector<2x128xf32>
    %c0_34 = arith.constant 0 : index
    %c0_35 = arith.constant 0 : index
    %27 = vector.load %arg7[%c0_34, %c0_35] : memref<128x8xf32, #tpu.memory_space<vmem>>, vector<128x8xf32>
    %cst_36 = arith.constant dense<0.000000e+00> : vector<2x8xf32>
    %28 = tpu.matmul %26, %27, %cst_36 {dimension_numbers = #tpu.dot_dimension_numbers<[1], [0], [0], [1], [0, 0, 1, 1], [], []>} : vector<2x128xf32>, vector<128x8xf32>, vector<2x8xf32> -> vector<2x8xf32>
    %cst_37 = arith.constant 0.001953125 : f32
    %29 = vector.broadcast %cst_37 : f32 to vector<2x8xf32>
    %30 = arith.mulf %28, %29 : vector<2x8xf32>
    %31 = vector.extract_strided_slice %30 {offsets = [0, 0], sizes = [1, 8], strides = [1, 1]} : vector<2x8xf32> to vector<1x8xf32>
    %32 = vector.extract_strided_slice %30 {offsets = [1, 0], sizes = [1, 8], strides = [1, 1]} : vector<2x8xf32> to vector<1x8xf32>
    %33 = arith.mulf %31, %31 : vector<1x8xf32>
    %34 = arith.subf %32, %33 : vector<1x8xf32>
    %cst_38 = arith.constant 0.000000e+00 : f32
    %35 = vector.broadcast %cst_38 : f32 to vector<1x8xf32>
    %36 = arith.maximumf %34, %35 : vector<1x8xf32>
    %c0_39 = arith.constant 0 : index
    %c0_40 = arith.constant 0 : index
    %37 = vector.load %arg2[%c0_39, %c0_40] : memref<1x8xf32, #tpu.memory_space<vmem>>, vector<1x8xf32>
    %cst_41 = arith.constant 9.99999974E-6 : f32
    %38 = vector.broadcast %cst_41 : f32 to vector<1x8xf32>
    %39 = arith.addf %36, %38 : vector<1x8xf32>
    %40 = math.rsqrt %39 : vector<1x8xf32>
    %41 = arith.mulf %37, %40 : vector<1x8xf32>
    %c0_42 = arith.constant 0 : index
    %c0_43 = arith.constant 0 : index
    %42 = vector.load %arg3[%c0_42, %c0_43] : memref<1x8xf32, #tpu.memory_space<vmem>>, vector<1x8xf32>
    %43 = arith.mulf %31, %41 : vector<1x8xf32>
    %44 = arith.subf %42, %43 : vector<1x8xf32>
    %45 = tpu.concatenate %41, %44 in 0 : vector<1x8xf32>, vector<1x8xf32> -> vector<2x8xf32>
    %c0_44 = arith.constant 0 : index
    %c0_45 = arith.constant 0 : index
    %46 = vector.load %arg8[%c0_44, %c0_45] : memref<8x128xf32, #tpu.memory_space<vmem>>, vector<8x128xf32>
    %cst_46 = arith.constant dense<0.000000e+00> : vector<2x128xf32>
    %47 = tpu.matmul %45, %46, %cst_46 {dimension_numbers = #tpu.dot_dimension_numbers<[1], [0], [0], [1], [0, 0, 1, 1], [], []>} : vector<2x8xf32>, vector<8x128xf32>, vector<2x128xf32> -> vector<2x128xf32>
    %48 = vector.extract_strided_slice %47 {offsets = [0, 0], sizes = [1, 128], strides = [1, 1]} : vector<2x128xf32> to vector<1x128xf32>
    %49 = vector.broadcast %48 : vector<1x128xf32> to vector<32x128xf32>
    %50 = arith.mulf %20, %49 : vector<32x128xf32>
    %51 = vector.extract_strided_slice %47 {offsets = [1, 0], sizes = [1, 128], strides = [1, 1]} : vector<2x128xf32> to vector<1x128xf32>
    %52 = vector.broadcast %51 : vector<1x128xf32> to vector<32x128xf32>
    %53 = arith.addf %50, %52 : vector<32x128xf32>
    %cst_47 = arith.constant 0.000000e+00 : f32
    %54 = vector.broadcast %cst_47 : f32 to vector<32x128xf32>
    %55 = arith.maximumf %53, %54 : vector<32x128xf32>
    %56 = vector.shape_cast %55 : vector<32x128xf32> to vector<2x16x128xf32>
    %cst_48 = arith.constant 0.000000e+00 : f32
    %57 = vector.broadcast %cst_48 : f32 to vector<2x16x8xf32>
    %cst_49 = arith.constant 0.000000e+00 : f32
    %58 = vector.broadcast %cst_49 : f32 to vector<2x1x128xf32>
    %c0_50 = arith.constant 0 : index
    %c0_51 = arith.constant 0 : index
    %c0_52 = arith.constant 0 : index
    %59 = vector.load %arg11[%c0_50, %c0_51, %c0_52] : memref<2x16x432xf32, #tpu.memory_space<vmem>>, vector<2x16x8xf32>
    tpu.vector_store %arg11[%c0_50, %c0_51, %c0_52], %57 {strides = array<i32>} : memref<2x16x432xf32, #tpu.memory_space<vmem>>, vector<2x16x8xf32>,
    %c0_53 = arith.constant 0 : index
    %c0_54 = arith.constant 0 : index
    %c136 = arith.constant 136 : index
    %60 = vector.load %arg11[%c0_53, %c0_54, %c136] : memref<2x16x432xf32, #tpu.memory_space<vmem>>, vector<2x16x8xf32>
    tpu.vector_store %arg11[%c0_53, %c0_54, %c136], %57 {strides = array<i32>} : memref<2x16x432xf32, #tpu.memory_space<vmem>>, vector<2x16x8xf32>,
    %c0_55 = arith.constant 0 : index
    %c0_56 = arith.constant 0 : index
    %c144_57 = arith.constant 144 : index
    %61 = vector.load %arg11[%c0_55, %c0_56, %c144_57] : memref<2x16x432xf32, #tpu.memory_space<vmem>>, vector<2x16x8xf32>
    tpu.vector_store %arg11[%c0_55, %c0_56, %c144_57], %57 {strides = array<i32>} : memref<2x16x432xf32, #tpu.memory_space<vmem>>, vector<2x16x8xf32>,
    %c0_58 = arith.constant 0 : index
    %c0_59 = arith.constant 0 : index
    %c280 = arith.constant 280 : index
    %62 = vector.load %arg11[%c0_58, %c0_59, %c280] : memref<2x16x432xf32, #tpu.memory_space<vmem>>, vector<2x16x8xf32>
    tpu.vector_store %arg11[%c0_58, %c0_59, %c280], %57 {strides = array<i32>} : memref<2x16x432xf32, #tpu.memory_space<vmem>>, vector<2x16x8xf32>,
    %c0_60 = arith.constant 0 : index
    %c0_61 = arith.constant 0 : index
    %c288 = arith.constant 288 : index
    %63 = vector.load %arg11[%c0_60, %c0_61, %c288] : memref<2x16x432xf32, #tpu.memory_space<vmem>>, vector<2x16x8xf32>
    tpu.vector_store %arg11[%c0_60, %c0_61, %c288], %57 {strides = array<i32>} : memref<2x16x432xf32, #tpu.memory_space<vmem>>, vector<2x16x8xf32>,
    %c0_62 = arith.constant 0 : index
    %c0_63 = arith.constant 0 : index
    %c424 = arith.constant 424 : index
    %64 = vector.load %arg11[%c0_62, %c0_63, %c424] : memref<2x16x432xf32, #tpu.memory_space<vmem>>, vector<2x16x8xf32>
    tpu.vector_store %arg11[%c0_62, %c0_63, %c424], %57 {strides = array<i32>} : memref<2x16x432xf32, #tpu.memory_space<vmem>>, vector<2x16x8xf32>,
    %c0_64 = arith.constant 0 : index
    %c0_65 = arith.constant 0 : index
    %c8 = arith.constant 8 : index
    %65 = vector.load %arg11[%c0_64, %c0_65, %c8] : memref<2x16x432xf32, #tpu.memory_space<vmem>>, vector<2x1x128xf32>
    tpu.vector_store %arg11[%c0_64, %c0_65, %c8], %58 {strides = array<i32>} : memref<2x16x432xf32, #tpu.memory_space<vmem>>, vector<2x1x128xf32>,
    %66 = vector.extract_strided_slice %56 {offsets = [0, 0, 0], sizes = [2, 15, 128], strides = [1, 1, 1]} : vector<2x16x128xf32> to vector<2x15x128xf32>
    %c0_66 = arith.constant 0 : index
    %c1_67 = arith.constant 1 : index
    %c8_68 = arith.constant 8 : index
    %67 = vector.load %arg11[%c0_66, %c1_67, %c8_68] : memref<2x16x432xf32, #tpu.memory_space<vmem>>, vector<2x15x128xf32>
    tpu.vector_store %arg11[%c0_66, %c1_67, %c8_68], %66 {strides = array<i32>} : memref<2x16x432xf32, #tpu.memory_space<vmem>>, vector<2x15x128xf32>,
    %c0_69 = arith.constant 0 : index
    %c0_70 = arith.constant 0 : index
    %c152 = arith.constant 152 : index
    %68 = vector.load %arg11[%c0_69, %c0_70, %c152] : memref<2x16x432xf32, #tpu.memory_space<vmem>>, vector<2x16x128xf32>
    tpu.vector_store %arg11[%c0_69, %c0_70, %c152], %56 {strides = array<i32>} : memref<2x16x432xf32, #tpu.memory_space<vmem>>, vector<2x16x128xf32>,
    %69 = vector.extract_strided_slice %56 {offsets = [0, 1, 0], sizes = [2, 15, 128], strides = [1, 1, 1]} : vector<2x16x128xf32> to vector<2x15x128xf32>
    %c0_71 = arith.constant 0 : index
    %c0_72 = arith.constant 0 : index
    %c296 = arith.constant 296 : index
    %70 = vector.load %arg11[%c0_71, %c0_72, %c296] : memref<2x16x432xf32, #tpu.memory_space<vmem>>, vector<2x15x128xf32>
    tpu.vector_store %arg11[%c0_71, %c0_72, %c296], %69 {strides = array<i32>} : memref<2x16x432xf32, #tpu.memory_space<vmem>>, vector<2x15x128xf32>,
    %c0_73 = arith.constant 0 : index
    %c15_74 = arith.constant 15 : index
    %c296_75 = arith.constant 296 : index
    %71 = vector.load %arg11[%c0_73, %c15_74, %c296_75] : memref<2x16x432xf32, #tpu.memory_space<vmem>>, vector<2x1x128xf32>
    tpu.vector_store %arg11[%c0_73, %c15_74, %c296_75], %58 {strides = array<i32>} : memref<2x16x432xf32, #tpu.memory_space<vmem>>, vector<2x1x128xf32>,
    %c0_76 = arith.constant 0 : index
    %c0_77 = arith.constant 0 : index
    %c0_78 = arith.constant 0 : index
    %72 = vector.load %arg11[%c0_76, %c0_77, %c0_78] : memref<2x16x432xf32, #tpu.memory_space<vmem>>, vector<2x16x432xf32>
    %73 = vector.shape_cast %72 : vector<2x16x432xf32> to vector<32x432xf32>
    %74 = arith.truncf %73 : vector<32x432xf32> to vector<32x432xbf16>
    %c0_79 = arith.constant 0 : index
    %c0_80 = arith.constant 0 : index
    %75 = vector.load %arg4[%c0_79, %c0_80] : memref<432x128xbf16, #tpu.memory_space<vmem>>, vector<432x128xbf16>
    %cst_81 = arith.constant dense<0.000000e+00> : vector<32x128xf32>
    %76 = tpu.matmul %74, %75, %cst_81 {dimension_numbers = #tpu.dot_dimension_numbers<[1], [0], [0], [1], [0, 0, 1, 1], [], []>} : vector<32x432xbf16>, vector<432x128xbf16>, vector<32x128xf32> -> vector<32x128xf32>
    %cst_82 = arith.constant dense<0.000000e+00> : vector<128xf32>
    %77 = vector.multi_reduction <add>, %76, %cst_82 [0] : vector<32x128xf32> to vector<128xf32>
    %78 = vector.shape_cast %77 : vector<128xf32> to vector<1x128xf32>
    %79 = arith.mulf %76, %76 : vector<32x128xf32>
    %cst_83 = arith.constant dense<0.000000e+00> : vector<128xf32>
    %80 = vector.multi_reduction <add>, %79, %cst_83 [0] : vector<32x128xf32> to vector<128xf32>
    %81 = vector.shape_cast %80 : vector<128xf32> to vector<1x128xf32>
    %82 = tpu.concatenate %78, %81 in 0 : vector<1x128xf32>, vector<1x128xf32> -> vector<2x128xf32>
    %c0_84 = arith.constant 0 : index
    %c0_85 = arith.constant 0 : index
    %83 = vector.load %arg7[%c0_84, %c0_85] : memref<128x8xf32, #tpu.memory_space<vmem>>, vector<128x8xf32>
    %cst_86 = arith.constant dense<0.000000e+00> : vector<2x8xf32>
    %84 = tpu.matmul %82, %83, %cst_86 {dimension_numbers = #tpu.dot_dimension_numbers<[1], [0], [0], [1], [0, 0, 1, 1], [], []>} : vector<2x128xf32>, vector<128x8xf32>, vector<2x8xf32> -> vector<2x8xf32>
    %cst_87 = arith.constant 0.001953125 : f32
    %85 = vector.broadcast %cst_87 : f32 to vector<2x8xf32>
    %86 = arith.mulf %84, %85 : vector<2x8xf32>
    %87 = vector.extract_strided_slice %86 {offsets = [0, 0], sizes = [1, 8], strides = [1, 1]} : vector<2x8xf32> to vector<1x8xf32>
    %88 = vector.extract_strided_slice %86 {offsets = [1, 0], sizes = [1, 8], strides = [1, 1]} : vector<2x8xf32> to vector<1x8xf32>
    %89 = arith.mulf %87, %87 : vector<1x8xf32>
    %90 = arith.subf %88, %89 : vector<1x8xf32>
    %cst_88 = arith.constant 0.000000e+00 : f32
    %91 = vector.broadcast %cst_88 : f32 to vector<1x8xf32>
    %92 = arith.maximumf %90, %91 : vector<1x8xf32>
    %c0_89 = arith.constant 0 : index
    %c0_90 = arith.constant 0 : index
    %93 = vector.load %arg5[%c0_89, %c0_90] : memref<1x8xf32, #tpu.memory_space<vmem>>, vector<1x8xf32>
    %cst_91 = arith.constant 9.99999974E-6 : f32
    %94 = vector.broadcast %cst_91 : f32 to vector<1x8xf32>
    %95 = arith.addf %92, %94 : vector<1x8xf32>
    %96 = math.rsqrt %95 : vector<1x8xf32>
    %97 = arith.mulf %93, %96 : vector<1x8xf32>
    %c0_92 = arith.constant 0 : index
    %c0_93 = arith.constant 0 : index
    %98 = vector.load %arg6[%c0_92, %c0_93] : memref<1x8xf32, #tpu.memory_space<vmem>>, vector<1x8xf32>
    %99 = arith.mulf %87, %97 : vector<1x8xf32>
    %100 = arith.subf %98, %99 : vector<1x8xf32>
    %101 = tpu.concatenate %97, %100 in 0 : vector<1x8xf32>, vector<1x8xf32> -> vector<2x8xf32>
    %c0_94 = arith.constant 0 : index
    %c0_95 = arith.constant 0 : index
    %102 = vector.load %arg8[%c0_94, %c0_95] : memref<8x128xf32, #tpu.memory_space<vmem>>, vector<8x128xf32>
    %cst_96 = arith.constant dense<0.000000e+00> : vector<2x128xf32>
    %103 = tpu.matmul %101, %102, %cst_96 {dimension_numbers = #tpu.dot_dimension_numbers<[1], [0], [0], [1], [0, 0, 1, 1], [], []>} : vector<2x8xf32>, vector<8x128xf32>, vector<2x128xf32> -> vector<2x128xf32>
    %104 = vector.extract_strided_slice %103 {offsets = [0, 0], sizes = [1, 128], strides = [1, 1]} : vector<2x128xf32> to vector<1x128xf32>
    %105 = vector.broadcast %104 : vector<1x128xf32> to vector<32x128xf32>
    %106 = arith.mulf %76, %105 : vector<32x128xf32>
    %107 = vector.extract_strided_slice %103 {offsets = [1, 0], sizes = [1, 128], strides = [1, 1]} : vector<2x128xf32> to vector<1x128xf32>
    %108 = vector.broadcast %107 : vector<1x128xf32> to vector<32x128xf32>
    %109 = arith.addf %106, %108 : vector<32x128xf32>
    %cst_97 = arith.constant 0.000000e+00 : f32
    %110 = vector.broadcast %cst_97 : f32 to vector<32x128xf32>
    %111 = arith.maximumf %109, %110 : vector<32x128xf32>
    %112 = arith.addf %55, %111 : vector<32x128xf32>
    %113 = vector.shape_cast %112 : vector<32x128xf32> to vector<2x16x128xf32>
    %c0_98 = arith.constant 0 : index
    %c0_99 = arith.constant 0 : index
    %c0_100 = arith.constant 0 : index
    %114 = vector.load %arg9[%c0_98, %c0_99, %c0_100] : memref<2x16x128xf32, #tpu.memory_space<vmem>>, vector<2x16x128xf32>
    tpu.vector_store %arg9[%c0_98, %c0_99, %c0_100], %113 {strides = array<i32>} : memref<2x16x128xf32, #tpu.memory_space<vmem>>, vector<2x16x128xf32>,
    return
  }
}

</mosaic_0001>

<bundles_post_ra>
// kernel: tile.9
= control target key start
LH: loop header
LB: loop body
LE: loop exit
PB: predicated region body
PF: predicated region fallthrough
CT: control target
= control target key end

     0   :  { %vm6_vm0 = vcmask 1043458   ;;  %vm10_vm1 = vcmask 1045508   ;;  %vm14_vm2 = vcmask 1047558   ;;  %s19_s6 = smov 3  ;;  %s22_s7 = smov 12  ;;  %vm16_vm3 = vcmask 64512   ;;  %s736_s0 = inlined_call_operand.vmem [shape: f32[16,8,8], index: 0, kind: input, shape index: {}]   ;;  %s737_s1 = inlined_call_operand.vmem [shape: f32[128,8], index: 1, kind: output, shape index: {}]  }
   0x1   :  { %v348_v0 = vld [vmem:[%s736_s0 + $0xf] ss:$16 sm:%s19_s6]   ;;  %s27_s12 = smov 48  ;;  %s32_s13 = smov 192  ;;  %vm38_vm4 = vcmask 1048512   ;;  %vm60_vm5 = vcmask 982912  }
   0x2   :  { %v349_v1 = vld [vmem:[%s736_s0 + $0xf] ss:$16 sm:%s22_s7]   ;;  %s63_s18 = smov 3  ;;  %s66_s21 = smov 12  ;;  %vm82_vm6 = vcmask 917312   ;;  %vm104_vm7 = vcmask 851712  }
   0x3   :  { %v25_v2 = vsel %vm6_vm0, %v349_v1, %v348_v0  ;;  %v350_v3 = vld [vmem:[%s736_s0 + $0xf] ss:$16 sm:%s27_s12]   ;;  %v356_v6 = vld [vmem:[%s736_s0 + $0xd] ss:$16 sm:%s63_s18]   ;;  %s71_s22 = smov 48  ;;  %s76_s27 = smov 192 }
   0x4   :  { %v351_v4 = vld [vmem:[%s736_s0 + $0xf] ss:$16 sm:%s32_s13]   ;;  %v30_v5 = vsel %vm10_vm1, %v350_v3, %v25_v2  ;;  %v357_v8 = vld [vmem:[%s736_s0 + $0xd] ss:$16 sm:%s66_s21]   ;;  %s423_s28 = smov 120   ;;  %s41_s2 = smov 3 }
   0x5   :  { %v35_v7 = vsel %vm14_vm2, %v351_v4, %v30_v5  ;;  %v358_v9 = vld [vmem:[%s736_s0 + $0xd] ss:$16 sm:%s71_s22]   ;;  %v69_v10 = vsel %vm6_vm0, %v357_v8, %v356_v6  ;;  %s44_s3 = smov 12  ;;  %v352_v13 = vld [vmem:[%s736_s0 + $0xe] ss:$16 sm:%s41_s2]   ;;  %s49_s8 = smov 48 }
   0x6   :  { %36 = vrot.lane.b32.xlu0 %v35_v7, %s423_s28  ;;  %v359_v11 = vld [vmem:[%s736_s0 + $0xd] ss:$16 sm:%s76_s27]   ;;  %v74_v12 = vsel %vm10_vm1, %v358_v9, %v69_v10  ;;  %s54_s9 = smov 192  ;;  %s85_s14 = smov 3  ;;  %vm126_vm8 = vcmask 786112   ;;  %vm148_vm9 = vcmask 720512  }
   0x7   :  { %v353_v14 = vld [vmem:[%s736_s0 + $0xe] ss:$16 sm:%s44_s3]   ;;  %v79_v15 = vsel %vm14_vm2, %v359_v11, %v74_v12  ;;  %s424_s15 = smov 104   ;;  %v360_v20 = vld [vmem:[%s736_s0 + $0xc] ss:$16 sm:%s85_s14]   ;;  %s88_s18 = smov 12 }
   0x8   :  { %v47_v16 = vsel %vm6_vm0, %v353_v14, %v352_v13  ;;  %v354_v17 = vld [vmem:[%s736_s0 + $0xe] ss:$16 sm:%s49_s8]   ;;  %80 = vrot.lane.b32.xlu1 %v79_v15, %s424_s15  ;;  %s93_s19 = smov 48  ;;  %s98_s24 = smov 192  ;;  %vm170_vm10 = vcmask 654912   ;;  %vm192_vm11 = vcmask 589312  }
   0x9   :  { %v355_v18 = vld [vmem:[%s736_s0 + $0xe] ss:$16 sm:%s54_s9]   ;;  %v52_v19 = vsel %vm10_vm1, %v354_v17, %v47_v16  ;;  %v361_v22 = vld [vmem:[%s736_s0 + $0xc] ss:$16 sm:%s88_s18]   ;;  %s425_s25 = smov 112   ;;  %s107_s28 = smov 3 }
   0xa   :  { %v57_v21 = vsel %vm14_vm2, %v355_v18, %v52_v19  ;;  %v362_v23 = vld [vmem:[%s736_s0 + $0xc] ss:$16 sm:%s93_s19]   ;;  %v91_v24 = vsel %vm6_vm0, %v361_v22, %v360_v20  ;;  %s110_s29 = smov 12  ;;  %v364_v27 = vld [vmem:[%s736_s0 + $0xb] ss:$16 sm:%s107_s28]   ;;  %s115_s5 = smov 48 }
   0xb   :  { %58 = vrot.lane.b32.xlu0 %v57_v21, %s425_s25  ;;  %v363_v25 = vld [vmem:[%s736_s0 + $0xc] ss:$16 sm:%s98_s24]   ;;  %v96_v26 = vsel %vm10_vm1, %v362_v23, %v91_v24  ;;  %s120_s6 = smov 192  ;;  %s129_s11 = smov 3  ;;  %vm214_vm12 = vcmask 523712   ;;  %vm236_vm13 = vcmask 458112  }
   0xc   :  { %v365_v28 = vld [vmem:[%s736_s0 + $0xb] ss:$16 sm:%s110_s29]   ;;  %v101_v29 = vsel %vm14_vm2, %v363_v25, %v96_v26  ;;  %s426_s12 = smov 96   ;;  %v368_v34 = vld [vmem:[%s736_s0 + $0xa] ss:$16 sm:%s129_s11]   ;;  %s132_s15 = smov 12 }
   0xd   :  { %v113_v30 = vsel %vm6_vm0, %v365_v28, %v364_v27  ;;  %v366_v31 = vld [vmem:[%s736_s0 + $0xb] ss:$16 sm:%s115_s5]   ;;  %102 = vrot.lane.b32.xlu1 %v101_v29, %s426_s12  ;;  %s137_s16 = smov 48  ;;  %s142_s21 = smov 192  ;;  %vm258_vm14 = vcmask 392512   ;;  %vm280_vm15 = vcmask 326912  }
   0xe   :  { %v367_v32 = vld [vmem:[%s736_s0 + $0xb] ss:$16 sm:%s120_s6]   ;;  %v118_v33 = vsel %vm10_vm1, %v366_v31, %v113_v30  ;;  %v369_v36 = vld [vmem:[%s736_s0 + $0xa] ss:$16 sm:%s132_s15]   ;;  %s427_s22 = smov 88   ;;  %s151_s25 = smov 3 }
   0xf   :  { %v123_v35 = vsel %vm14_vm2, %v367_v32, %v118_v33  ;;  %v370_v37 = vld [vmem:[%s736_s0 + $0xa] ss:$16 sm:%s137_s16]   ;;  %v135_v38 = vsel %vm6_vm0, %v369_v36, %v368_v34  ;;  %s154_s26 = smov 12  ;;  %v372_v41 = vld [vmem:[%s736_s0 + $0x9] ss:$16 sm:%s151_s25]   ;;  %s159_s2 = smov 48 }
  0x10   :  { %124 = vrot.lane.b32.xlu0 %v123_v35, %s427_s22  ;;  %v371_v39 = vld [vmem:[%s736_s0 + $0xa] ss:$16 sm:%s142_s21]   ;;  %v140_v40 = vsel %vm10_vm1, %v370_v37, %v135_v38  ;;  %s164_s3 = smov 192  ;;  %s173_s8 = smov 3 }
  0x11   :  { %v373_v42 = vld [vmem:[%s736_s0 + $0x9] ss:$16 sm:%s154_s26]   ;;  %v145_v43 = vsel %vm14_vm2, %v371_v39, %v140_v40  ;;  %s428_s9 = smov 80   ;;  %v376_v48 = vld [vmem:[%s736_s0 + $0x8] ss:$16 sm:%s173_s8]   ;;  %s176_s12 = smov 12 }
  0x12   :  { %v157_v44 = vsel %vm6_vm0, %v373_v42, %v372_v41  ;;  %v374_v45 = vld [vmem:[%s736_s0 + $0x9] ss:$16 sm:%s159_s2]   ;;  %146 = vrot.lane.b32.xlu1 %v145_v43, %s428_s9  ;;  %s181_s13 = smov 48  ;;  %s186_s18 = smov 192 }
  0x13   :  { %v375_v46 = vld [vmem:[%s736_s0 + $0x9] ss:$16 sm:%s164_s3]   ;;  %v162_v47 = vsel %vm10_vm1, %v374_v45, %v157_v44  ;;  %v377_v50 = vld [vmem:[%s736_s0 + $0x8] ss:$16 sm:%s176_s12]   ;;  %s429_s19 = smov 72   ;;  %s195_s22 = smov 3 }
  0x14   :  { %v167_v49 = vsel %vm14_vm2, %v375_v46, %v162_v47  ;;  %v378_v51 = vld [vmem:[%s736_s0 + $0x8] ss:$16 sm:%s181_s13]   ;;  %v179_v52 = vsel %vm6_vm0, %v377_v50, %v376_v48  ;;  %s198_s23 = smov 12  ;;  %v380_v55 = vld [vmem:[%s736_s0 + $0x7] ss:$16 sm:%s195_s22]   ;;  %s203_s28 = smov 48 }
  0x15   :  { %168 = vrot.lane.b32.xlu0 %v167_v49, %s429_s19  ;;  %v379_v53 = vld [vmem:[%s736_s0 + $0x8] ss:$16 sm:%s186_s18]   ;;  %v184_v54 = vsel %vm10_vm1, %v378_v51, %v179_v52  ;;  %s208_s29 = smov 192  ;;  %s217_s5 = smov 3 }
  0x16   :  { %v381_v56 = vld [vmem:[%s736_s0 + $0x7] ss:$16 sm:%s198_s23]   ;;  %v189_v57 = vsel %vm14_vm2, %v379_v53, %v184_v54  ;;  %s430_s6 = smov 64   ;;  %v384_v62 = vld [vmem:[%s736_s0 + $0x6] ss:$16 sm:%s217_s5]   ;;  %s220_s9 = smov 12 }
  0x17   :  { %v201_v58 = vsel %vm6_vm0, %v381_v56, %v380_v55  ;;  %v382_v59 = vld [vmem:[%s736_s0 + $0x7] ss:$16 sm:%s203_s28]   ;;  %190 = vrot.lane.b32.xlu1 %v189_v57, %s430_s6  ;;  %s225_s10 = smov 48  ;;  %s230_s15 = smov 192 }
  0x18   :  { %v383_v60 = vld [vmem:[%s736_s0 + $0x7] ss:$16 sm:%s208_s29]   ;;  %v206_v61 = vsel %vm10_vm1, %v382_v59, %v201_v58  ;;  %v385_v0 = vld [vmem:[%s736_s0 + $0x6] ss:$16 sm:%s220_s9]   ;;  %s431_s16 = smov 56   ;;  %s239_s19 = smov 3 }
  0x19   :  { %v211_v63 = vsel %vm14_vm2, %v383_v60, %v206_v61  ;;  %v386_v1 = vld [vmem:[%s736_s0 + $0x6] ss:$16 sm:%s225_s10]   ;;  %v223_v2 = vsel %vm6_vm0, %v385_v0, %v384_v62  ;;  %s242_s20 = smov 12  ;;  %v388_v5 = vld [vmem:[%s736_s0 + $0x5] ss:$16 sm:%s239_s19]   ;;  %s247_s25 = smov 48 }
  0x1a   :  { %212 = vrot.lane.b32.xlu0 %v211_v63, %s431_s16  ;;  %v387_v3 = vld [vmem:[%s736_s0 + $0x6] ss:$16 sm:%s230_s15]   ;;  %v228_v4 = vsel %vm10_vm1, %v386_v1, %v223_v2  ;;  %s252_s26 = smov 192  ;;  %s261_s2 = smov 3 }
  0x1b   :  { %v389_v6 = vld [vmem:[%s736_s0 + $0x5] ss:$16 sm:%s242_s20]   ;;  %v233_v7 = vsel %vm14_vm2, %v387_v3, %v228_v4  ;;  %s432_s3 = smov 48   ;;  %v392_v12 = vld [vmem:[%s736_s0 + $0x4] ss:$16 sm:%s261_s2]   ;;  %s264_s6 = smov 12 }
  0x1c   :  { %v245_v8 = vsel %vm6_vm0, %v389_v6, %v388_v5  ;;  %v390_v9 = vld [vmem:[%s736_s0 + $0x5] ss:$16 sm:%s247_s25]   ;;  %234 = vrot.lane.b32.xlu1 %v233_v7, %s432_s3  ;;  %s269_s7 = smov 48  ;;  %s274_s12 = smov 192 }
  0x1d   :  { %v391_v10 = vld [vmem:[%s736_s0 + $0x5] ss:$16 sm:%s252_s26]   ;;  %v250_v11 = vsel %vm10_vm1, %v390_v9, %v245_v8  ;;  %v393_v14 = vld [vmem:[%s736_s0 + $0x4] ss:$16 sm:%s264_s6]   ;;  %s433_s13 = smov 40   ;;  %s283_s16 = smov 3 }
  0x1e   :  { %v255_v13 = vsel %vm14_vm2, %v391_v10, %v250_v11  ;;  %v394_v15 = vld [vmem:[%s736_s0 + $0x4] ss:$16 sm:%s269_s7]   ;;  %v267_v16 = vsel %vm6_vm0, %v393_v14, %v392_v12  ;;  %s286_s17 = smov 12  ;;  %v396_v19 = vld [vmem:[%s736_s0 + $0x3] ss:$16 sm:%s283_s16]   ;;  %s291_s22 = smov 48 }
  0x1f   :  { %256 = vrot.lane.b32.xlu0 %v255_v13, %s433_s13  ;;  %v395_v17 = vld [vmem:[%s736_s0 + $0x4] ss:$16 sm:%s274_s12]   ;;  %v272_v18 = vsel %vm10_vm1, %v394_v15, %v267_v16  ;;  %s296_s23 = smov 192  ;;  %s305_s28 = smov 3 }
  0x20   :  { %v397_v20 = vld [vmem:[%s736_s0 + $0x3] ss:$16 sm:%s286_s17]   ;;  %v277_v21 = vsel %vm14_vm2, %v395_v17, %v272_v18  ;;  %s434_s29 = smov 32   ;;  %v400_v26 = vld [vmem:[%s736_s0 + $0x2] ss:$16 sm:%s305_s28]   ;;  %s308_s3 = smov 12 }
  0x21   :  { %v289_v22 = vsel %vm6_vm0, %v397_v20, %v396_v19  ;;  %v398_v23 = vld [vmem:[%s736_s0 + $0x3] ss:$16 sm:%s291_s22]   ;;  %278 = vrot.lane.b32.xlu1 %v277_v21, %s434_s29  ;;  %s313_s4 = smov 48  ;;  %s318_s9 = smov 192 }
  0x22   :  { %v399_v24 = vld [vmem:[%s736_s0 + $0x3] ss:$16 sm:%s296_s23]   ;;  %v294_v25 = vsel %vm10_vm1, %v398_v23, %v289_v22  ;;  %v401_v28 = vld [vmem:[%s736_s0 + $0x2] ss:$16 sm:%s308_s3]   ;;  %s435_s10 = smov 24   ;;  %s327_s13 = smov 3 }
  0x23   :  { %v299_v27 = vsel %vm14_vm2, %v399_v24, %v294_v25  ;;  %v402_v29 = vld [vmem:[%s736_s0 + $0x2] ss:$16 sm:%s313_s4]   ;;  %v311_v30 = vsel %vm6_vm0, %v401_v28, %v400_v26  ;;  %s330_s14 = smov 12  ;;  %v404_v33 = vld [vmem:[%s736_s0 + $0x1] ss:$16 sm:%s327_s13]   ;;  %s335_s19 = smov 48 }
  0x24   :  { %300 = vrot.lane.b32.xlu0 %v299_v27, %s435_s10  ;;  %v403_v31 = vld [vmem:[%s736_s0 + $0x2] ss:$16 sm:%s318_s9]   ;;  %v316_v32 = vsel %vm10_vm1, %v402_v29, %v311_v30  ;;  %s340_s20 = smov 192  ;;  %s2_s25 = smov 3 }
  0x25   :  { %v405_v34 = vld [vmem:[%s736_s0 + $0x1] ss:$16 sm:%s330_s14]   ;;  %v321_v35 = vsel %vm14_vm2, %v403_v31, %v316_v32  ;;  %s436_s26 = smov 16   ;;  %s4_s27 = smov 12  ;;  %v3_v40 = vld [vmem:[%s736_s0] ss:$16 sm:%s2_s25]  }
  0x26   :  { %v333_v36 = vsel %vm6_vm0, %v405_v34, %v404_v33  ;;  %v406_v37 = vld [vmem:[%s736_s0 + $0x1] ss:$16 sm:%s335_s19]   ;;  %322 = vrot.lane.b32.xlu1 %v321_v35, %s436_s26  ;;  %s8_s28 = smov 48  ;;  %s12_s2 = smov 192 }
  0x27   :  { %v407_v38 = vld [vmem:[%s736_s0 + $0x1] ss:$16 sm:%s340_s20]   ;;  %v338_v39 = vsel %vm10_vm1, %v406_v37, %v333_v36  ;;  %v5_v42 = vld [vmem:[%s736_s0] ss:$16 sm:%s4_s27]   ;;  %s437_s7 = smov 8  }
  0x28   :  { %v343_v41 = vsel %vm14_vm2, %v407_v38, %v338_v39  ;;  %v9_v43 = vld [vmem:[%s736_s0] ss:$16 sm:%s8_s28]   ;;  %v7_v44 = vsel %vm6_vm0, %v5_v42, %v3_v40  ;;  %vm302_vm0 = vcmask 261312  }
  0x29   :  { %344 = vrot.lane.b32.xlu0 %v343_v41, %s437_s7  ;;  %v13_v45 = vld [vmem:[%s736_s0] ss:$16 sm:%s12_s2]   ;;  %v11_v46 = vsel %vm10_vm1, %v9_v43, %v7_v44  ;;  %vm324_vm1 = vcmask 195712  }
  0x2a   :  { %v15_v47 = vsel %vm14_vm2, %v13_v45, %v11_v46  ;;  %vm346_vm2 = vcmask 130112  }
  0x2b   :  { %17 = vst.msk [vmem:[%s737_s1] sm:$0xff] %vm16_vm3, %v15_v47  }
  0x78   :  { %v37_v48 = vpop.permute.xlu0 %36  }
  0x79   :  { %39 = vst.msk [vmem:[%s737_s1] sm:$0xff] %vm38_vm4, %v37_v48  }
  0x7a   :  { %v81_v49 = vpop.permute.xlu1 %80  }
  0x7d   :  { %v59_v50 = vpop.permute.xlu0 %58  }
  0x7e   :  { %61 = vst.msk [vmem:[%s737_s1] sm:$0xff] %vm60_vm5, %v59_v50  }
  0x7f   :  { %83 = vst.msk [vmem:[%s737_s1] sm:$0xff] %vm82_vm6, %v81_v49   ;;  %v103_v51 = vpop.permute.xlu1 %102  }
  0x80   :  { %105 = vst.msk [vmem:[%s737_s1] sm:$0xff] %vm104_vm7, %v103_v51  }
  0x82   :  { %v125_v52 = vpop.permute.xlu0 %124  }
  0x83   :  { %127 = vst.msk [vmem:[%s737_s1] sm:$0xff] %vm126_vm8, %v125_v52  }
  0x84   :  { %v147_v53 = vpop.permute.xlu1 %146  }
  0x85   :  { %149 = vst.msk [vmem:[%s737_s1] sm:$0xff] %vm148_vm9, %v147_v53  }
  0x87   :  { %v169_v54 = vpop.permute.xlu0 %168  }
  0x88   :  { %171 = vst.msk [vmem:[%s737_s1] sm:$0xff] %vm170_vm10, %v169_v54  }
  0x89   :  { %v191_v55 = vpop.permute.xlu1 %190  }
  0x8a   :  { %193 = vst.msk [vmem:[%s737_s1] sm:$0xff] %vm192_vm11, %v191_v55  }
  0x8c   :  { %v213_v56 = vpop.permute.xlu0 %212  }
  0x8d   :  { %215 = vst.msk [vmem:[%s737_s1] sm:$0xff] %vm214_vm12, %v213_v56  }
  0x8e   :  { %v235_v57 = vpop.permute.xlu1 %234  }
  0x8f   :  { %237 = vst.msk [vmem:[%s737_s1] sm:$0xff] %vm236_vm13, %v235_v57  }
  0x91   :  { %v257_v58 = vpop.permute.xlu0 %256  }
  0x92   :  { %259 = vst.msk [vmem:[%s737_s1] sm:$0xff] %vm258_vm14, %v257_v58  }
  0x93   :  { %v279_v59 = vpop.permute.xlu1 %278  }
  0x94   :  { %281 = vst.msk [vmem:[%s737_s1] sm:$0xff] %vm280_vm15, %v279_v59  }
  0x96   :  { %v301_v60 = vpop.permute.xlu0 %300  }
  0x97   :  { %303 = vst.msk [vmem:[%s737_s1] sm:$0xff] %vm302_vm0, %v301_v60  }
  0x98   :  { %v323_v61 = vpop.permute.xlu1 %322  }
  0x99   :  { %325 = vst.msk [vmem:[%s737_s1] sm:$0xff] %vm324_vm1, %v323_v61  }
  0x9b   :  { %v345_v62 = vpop.permute.xlu0 %344  }
  0x9c   :  { %347 = vst.msk [vmem:[%s737_s1] sm:$0xff] %vm346_vm2, %v345_v62  }

// kernel: skip_bn_block.1
= control target key start
LH: loop header
LB: loop body
LE: loop exit
PB: predicated region body
PF: predicated region fallthrough
CT: control target
= control target key end

     0   :  { %v1592_v2 = vmov 0   ;;  %vm52_vm0 = vcmask 130144   ;;  %vm57_vm1 = vcmask 162944   ;;  %s1593_s13 = smov 76   ;;  %vm74_vm2 = vcmask 1040384   ;;  %s1595_s16 = smov 4   ;;  %s2173_s0 = inlined_call_operand.vmem [shape: f32[2,16,64], index: 0, kind: input, shape index: {}]   ;;  %s2174_s1 = inlined_call_operand.vmem [shape: bf16[216,128], index: 1, kind: input, shape index: {}]   ;;  %s2175_s7 = inlined_call_operand.vmem [shape: f32[128,8], index: 7, kind: input, shape index: {}]   ;;  %s2176_s8 = inlined_call_operand.vmem [shape: f32[8,128], index: 8, kind: input, shape index: {}]   ;;  %s2177_s2 = inlined_call_operand.vmem [shape: f32[1,8], index: 2, kind: input, shape index: {}]   ;;  %s2178_s3 = inlined_call_operand.vmem [shape: f32[1,8], index: 3, kind: input, shape index: {}]   ;;  %s2179_s4 = inlined_call_operand.vmem [shape: bf16[432,128], index: 4, kind: input, shape index: {}]   ;;  %s2180_s5 = inlined_call_operand.vmem [shape: f32[1,8], index: 5, kind: input, shape index: {}]   ;;  %s2181_s6 = inlined_call_operand.vmem [shape: f32[1,8], index: 6, kind: input, shape index: {}]   ;;  %s2182_s9 = inlined_call_operand.vmem [shape: f32[2,16,128], index: 9, kind: output, shape index: {}]  }
   0x1   :  { %v33_v0 = vld [vmem:[%s2173_s0] sm:$0xff]  ;;  %v34_v1 = vld [vmem:[%s2173_s0 + $0x8] sm:$0xff]  ;;  %280 = vmatprep.subr.bf16.mxu0 %v1592_v2  ;;  %v1594_v6 = vmov 0.0   ;;  %vm121_vm3 = vcmask 1046528   ;;  %vm62_vm4 = vcmask 720544   ;;  %vm37_vm5 = vcmask 31744  }
   0x2   :  { %99 = vrot.lane.b32.xlu0 %v33_v0, %s1593_s13  ;;  %v75_v3 = vrot.slane %v33_v0, 7  ;;  %v76_v4 = vrot.slane %v34_v1, 7  ;;  %v1547_v5 = vld [vmem:[%s2174_s1] sm:$0xff]   ;;  %53 = vst.msk [vmem:[#allocation2 + $0x8] sm:$0xff] %vm52_vm0, %v1594_v6  ;;  %54 = vst.msk [vmem:[#allocation2 + $0x18] sm:$0xff] %vm52_vm0, %v1594_v6  ;;  %v122_v7 = vrot.slane %v33_v0, 1 }
   0x3   :  { %55 = vst.msk [vmem:[#allocation2 + $0x28] sm:$0xff] %vm52_vm0, %v1594_v6  ;;  %56 = vst.msk [vmem:[#allocation2 + $0x38] sm:$0xff] %vm52_vm0, %v1594_v6  ;;  %v123_v8 = vrot.slane %v34_v1, 1  ;;  %281 = vmatpush1.bf16.msra.mxu0 %v1547_v5  ;;  %v1548_v10 = vld [vmem:[%s2174_s1 + $0x8] sm:$0xff]   ;;  %v1549_v12 = vld [vmem:[%s2174_s1 + $0x10] sm:$0xff]   ;;  %vm42_vm6 = vcmask 589344  }
   0x4   :  { %58 = vst.msk [vmem:[#allocation2 + $0x8] sm:$0xff] %vm57_vm1, %v1594_v6  ;;  %59 = vst.msk [vmem:[#allocation2 + $0x18] sm:$0xff] %vm57_vm1, %v1594_v6  ;;  %81 = vrot.lane.b32.xlu1 %v75_v3, %s1595_s16  ;;  %v77_v9 = vsel %vm74_vm2, %v75_v3, %v76_v4  ;;  %282 = vmatprep.subr.bf16.mxu0 %v1592_v2  ;;  %vm47_vm7 = vcmask 622144   ;;  %s1596_s21 = smov 20   ;;  %v36_v13 = vld [vmem:[%s2173_s0 + $0x18] sm:$0xff]  ;;  %vm67_vm8 = vcmask 548896  }
   0x5   :  { %60 = vst.msk [vmem:[#allocation2 + $0x28] sm:$0xff] %vm57_vm1, %v1594_v6  ;;  %61 = vst.msk [vmem:[#allocation2 + $0x38] sm:$0xff] %vm57_vm1, %v1594_v6  ;;  %v124_v11 = vsel %vm121_vm3, %v122_v7, %v123_v8  ;;  %v35_v14 = vld [vmem:[%s2173_s0 + $0x10] sm:$0xff]  ;;  %v1550_v15 = vld [vmem:[%s2174_s1 + $0x18] sm:$0xff]   ;;  %v79_v16 = vrot.slane %v36_v13, 7  ;;  %v126_v19 = vrot.slane %v36_v13, 1 }
   0x6   :  { %101 = vrot.lane.b32.xlu0 %v34_v1, %s1593_s13  ;;  %63 = vst.msk [vmem:[#allocation2 + $0x8] sm:$0xff] %vm62_vm4, %v1594_v6  ;;  %64 = vst.msk [vmem:[#allocation2 + $0x18] sm:$0xff] %vm62_vm4, %v1594_v6  ;;  %v78_v17 = vrot.slane %v35_v14, 7  ;;  %v125_v18 = vrot.slane %v35_v14, 1  ;;  %v1551_v20 = vld [vmem:[%s2174_s1 + $0x20] sm:$0xff]   ;;  %v1552_v23 = vld [vmem:[%s2174_s1 + $0x28] sm:$0xff]  }
   0x7   :  { %65 = vst.msk [vmem:[#allocation2 + $0x28] sm:$0xff] %vm62_vm4, %v1594_v6  ;;  %66 = vst.msk [vmem:[#allocation2 + $0x38] sm:$0xff] %vm62_vm4, %v1594_v6  ;;  %283 = vmatpush1.bf16.msra.mxu0 %v1548_v10  ;;  %v1553_v24 = vld [vmem:[%s2174_s1 + $0x30] sm:$0xff]   ;;  %v1554_v25 = vld [vmem:[%s2174_s1 + $0x38] sm:$0xff]   ;;  %vm276_vm9 = vcmask 1043456   ;;  %vm113_vm10 = vcmask 97280  }
   0x8   :  { %83 = vrot.lane.b32.xlu1 %v77_v9, %s1595_s16  ;;  %38 = vst.msk [vmem:[#allocation2] sm:$0xff] %vm37_vm5, %v1594_v6  ;;  %39 = vst.msk [vmem:[#allocation2 + $0x10] sm:$0xff] %vm37_vm5, %v1594_v6  ;;  %284 = vmatprep.subr.bf16.mxu0 %v1592_v2  ;;  %v80_v21 = vsel %vm74_vm2, %v78_v17, %v79_v16  ;;  %v127_v22 = vsel %vm121_vm3, %v125_v18, %v126_v19  ;;  %v1555_v26 = vld [vmem:[%s2174_s1 + $0x40] sm:$0xff]   ;;  %v1556_v27 = vld [vmem:[%s2174_s1 + $0x48] sm:$0xff]   ;;  %vm93_vm11 = vcmask 556065   ;;  %vm111_vm12 = vcmask 1048160  }
   0x9   :  { %40 = vst.msk [vmem:[#allocation2 + $0x20] sm:$0xff] %vm37_vm5, %v1594_v6  ;;  %41 = vst.msk [vmem:[#allocation2 + $0x30] sm:$0xff] %vm37_vm5, %v1594_v6  ;;  %v1557_v28 = vld [vmem:[%s2174_s1 + $0x50] sm:$0xff]   ;;  %v1558_v29 = vld [vmem:[%s2174_s1 + $0x58] sm:$0xff]   ;;  %vm146_vm13 = vcmask 680096   ;;  %vm95_vm14 = vcmask 556064  }
   0xa   :  { %43 = vst.msk [vmem:[#allocation2] sm:$0xff] %vm42_vm6, %v1594_v6  ;;  %44 = vst.msk [vmem:[#allocation2 + $0x10] sm:$0xff] %vm42_vm6, %v1594_v6  ;;  %128 = vrot.lane.b32.xlu0 %v124_v11, %s1596_s21  ;;  %v1559_v30 = vld [vmem:[%s2174_s1 + $0x60] sm:$0xff]   ;;  %v1560_v31 = vld [vmem:[%s2174_s1 + $0x68] ss:$0 sps:$4 sm:$0xff]   ;;  %vm140_vm15 = vcmask 687264  }
   0xb   :  { %45 = vst.msk [vmem:[#allocation2 + $0x20] sm:$0xff] %vm42_vm6, %v1594_v6  ;;  %46 = vst.msk [vmem:[#allocation2 + $0x30] sm:$0xff] %vm42_vm6, %v1594_v6  ;;  %285 = vmatpush1.bf16.msra.mxu0 %v1549_v12  ;;  %v278_v32 = vsel %vm276_vm9, %v1560_v31, 0  ;;  %vm142_vm0 = vcmask 686240   ;;  %vm269_vm1 = vcmask 719872   ;;  %v352_v57 = vld [vmem:[%s2175_s7] sm:$0xff] }
   0xc   :  { %48 = vst.msk [vmem:[#allocation2] sm:$0xff] %vm47_vm7, %v1594_v6  ;;  %49 = vst.msk [vmem:[#allocation2 + $0x10] sm:$0xff] %vm47_vm7, %v1594_v6  ;;  %130 = vrot.lane.b32.xlu1 %v123_v8, %s1596_s21  ;;  %286 = vmatprep.subr.bf16.mxu0 %v1592_v2  ;;  %v353_v58 = vld [vmem:[%s2175_s7 + $0x8] sm:$0xff]  ;;  %v1597_v60 = vmov 0.0|0.0   ;;  %v354_v61 = vld [vmem:[%s2175_s7 + $0x10] sm:$0xff]  ;;  %vm1598_vm4 = vmmov 0  }
   0xd   :  { %50 = vst.msk [vmem:[#allocation2 + $0x20] sm:$0xff] %vm47_vm7, %v1594_v6  ;;  %51 = vst.msk [vmem:[#allocation2 + $0x30] sm:$0xff] %vm47_vm7, %v1594_v6  ;;  %v1796_v59 = vpack.c.bf16 %v353_v58, %v352_v57  ;;  %1488 = vmatprep.subr.bf16.mxu1 %v1597_v60  ;;  %v355_v62 = vld [vmem:[%s2175_s7 + $0x18] sm:$0xff]  ;;  %v356_v0 = vld [vmem:[%s2175_s7 + $0x20] sm:$0xff]  ;;  %1440 = vmatprep.mubr.msk.f32.mxu1 %vm1598_vm4, %v1594_v6  ;;  %vm477_vm5 = vcmask 64512   ;;  %vm585_vm6 = vcmask 261312  }
   0xe   :  { %68 = vst.msk [vmem:[#allocation2] sm:$0x1] %vm67_vm8, %v1594_v6  ;;  %69 = vst.msk [vmem:[#allocation2 + $0x20] sm:$0x1] %vm67_vm8, %v1594_v6  ;;  %103 = vrot.lane.b32.xlu0 %v35_v14, %s1593_s13  ;;  %v1807_v63 = vpack.c.bf16 %v355_v62, %v354_v61  ;;  %v357_v1 = vld [vmem:[%s2175_s7 + $0x28] sm:$0xff]  ;;  %v358_v4 = vld [vmem:[%s2175_s7 + $0x30] sm:$0xff] }
   0xf   :  { %287 = vmatpush1.bf16.msra.mxu0 %v1550_v15  ;;  %1490 = vmatpush3.bf16.msra.mxu1 %v1796_v59  ;;  %v1817_v3 = vpack.c.bf16 %v357_v1, %v356_v0  ;;  %v359_v5 = vld [vmem:[%s2175_s7 + $0x38] sm:$0xff]  ;;  %v360_v8 = vld [vmem:[%s2175_s7 + $0x40] sm:$0xff]  ;;  %v361_v9 = vld [vmem:[%s2175_s7 + $0x48] sm:$0xff]  ;;  %571 = vst.msk [vmem:[#allocation3] sm:$0xff] %vm477_vm5, %v1594_v6  ;;  %v1599_v62 = vmov 1966171168   ;;  %v452_v1 = vlaneseq }
  0x10   :  { %105 = vrot.lane.b32.xlu1 %v36_v13, %s1593_s13  ;;  %288 = vmatprep.subr.bf16.mxu0 %v1592_v2  ;;  %v1827_v7 = vpack.c.bf16 %v359_v5, %v358_v4  ;;  %v1837_v10 = vpack.c.bf16 %v361_v9, %v360_v8  ;;  %v362_v11 = vld [vmem:[%s2175_s7 + $0x50] sm:$0xff]  ;;  %v363_v12 = vld [vmem:[%s2175_s7 + $0x58] sm:$0xff]  ;;  %v364_v14 = vld [vmem:[%s2175_s7 + $0x60] sm:$0xff]  ;;  %572 = vst.msk [vmem:[#allocation3 + $0x20] sm:$0xff] %vm477_vm5, %v1594_v6  ;;  %v450_v0 = vunpack.c.l.s4 %v1599_v62  ;;  %vm590_vm7 = vcmask 326912   ;;  %s1600_s10 = smov 24  }
  0x11   :  { %1491 = vmatprep.subr.bf16.mxu1 %v1597_v60  ;;  %v1847_v13 = vpack.c.bf16 %v363_v12, %v362_v11  ;;  %v365_v15 = vld [vmem:[%s2175_s7 + $0x68] sm:$0xff]  ;;  %v367_v18 = vld [vmem:[%s2175_s7 + $0x78] sm:$0xff]  ;;  %573 = vst.msk [vmem:[#allocation3 + $0x40] sm:$0xff] %vm477_vm5, %v1594_v6  ;;  %574 = vst.msk [vmem:[#allocation3 + $0x60] sm:$0xff] %vm477_vm5, %v1594_v6  ;;  %v1910_v5 = vshrl.u32 %v452_v1, 7  ;;  %vm595_vm8 = vcmask 392512  }
  0x12   :  { %85 = vrot.lane.b32.xlu0 %v78_v17, %s1595_s16  ;;  %v1857_v16 = vpack.c.bf16 %v365_v15, %v364_v14  ;;  %v366_v17 = vld [vmem:[%s2175_s7 + $0x70] sm:$0xff]  ;;  %v451_v4 = vunpack.c.0.s8 %v450_v0  ;;  %v445_v14 = vld [vmem:[%s2177_s2] sm:$0x1]  ;;  %587 = vst.msk [vmem:[#allocation3 + $0x30] sm:$0xff] %vm585_vm6, %v1594_v6  ;;  %586 = vst.msk [vmem:[#allocation3 + $0x10] sm:$0xff] %vm585_vm6, %v1594_v6  ;;  %vm693_vm9 = vcmask 319488  }
  0x13   :  { %289 = vmatpush1.bf16.msra.mxu0 %v1551_v20  ;;  %1493 = vmatpush3.bf16.msra.mxu1 %v1807_v63  ;;  %588 = vst.msk [vmem:[#allocation3 + $0x50] sm:$0xff] %vm585_vm6, %v1594_v6  ;;  %589 = vst.msk [vmem:[#allocation3 + $0x70] sm:$0xff] %vm585_vm6, %v1594_v6  ;;  %v1581_v0 = vld [vmem:[%s2179_s4 + $0x70] sm:$0xff]   ;;  %v1582_v1 = vld [vmem:[%s2179_s4 + $0xc0] sm:$0xff]   ;;  %s1601_s15 = smov 40   ;;  %s1602_s2 = smov 8  }
  0x14   :  { %87 = vrot.lane.b32.xlu1 %v80_v21, %s1595_s16  ;;  %290 = vmatprep.subr.bf16.mxu0 %v1592_v2  ;;  %v1913_v8 = vsub.s32 %v451_v4, %v1910_v5  ;;  %592 = vst.msk [vmem:[#allocation3 + $0x30] sm:$0xff] %vm590_vm7, %v1594_v6  ;;  %591 = vst.msk [vmem:[#allocation3 + $0x10] sm:$0xff] %vm590_vm7, %v1594_v6  ;;  %v1583_v4 = vld [vmem:[%s2179_s4 + $0x30] sm:$0xff]   ;;  %vm628_vm6 = vcmask 1047617  }
  0x15   :  { %1494 = vmatprep.subr.bf16.mxu1 %v1597_v60  ;;  %593 = vst.msk [vmem:[#allocation3 + $0x50] sm:$0xff] %vm590_vm7, %v1594_v6  ;;  %594 = vst.msk [vmem:[#allocation3 + $0x70] sm:$0xff] %vm590_vm7, %v1594_v6  ;;  %vm630_vm7 = vcmask 64513  }
  0x16   :  { %132 = vrot.lane.b32.xlu0 %v127_v22, %s1596_s21  ;;  %597 = vst.msk [vmem:[#allocation3 + $0x38] sm:$0xff] %vm595_vm8, %v1594_v6  ;;  %596 = vst.msk [vmem:[#allocation3 + $0x18] sm:$0xff] %vm595_vm8, %v1594_v6 }
  0x17   :  { %291 = vmatpush1.bf16.msra.mxu0 %v1552_v23  ;;  %1496 = vmatpush3.bf16.msra.mxu1 %v1817_v3  ;;  %598 = vst.msk [vmem:[#allocation3 + $0x58] sm:$0xff] %vm595_vm8, %v1594_v6  ;;  %599 = vst.msk [vmem:[#allocation3 + $0x78] sm:$0xff] %vm595_vm8, %v1594_v6  ;;  %vm651_vm8 = vcmask 1047744  }
  0x18   :  { %134 = vrot.lane.b32.xlu1 %v126_v19, %s1596_s21  ;;  %292 = vmatprep.subr.bf16.mxu0 %v1592_v2  ;;  %v1868_v19 = vpack.c.bf16 %v367_v18, %v366_v17  ;;  %v466_v18 = vld [vmem:[%s2178_s3] sm:$0x1]  ;;  %694 = vst.msk [vmem:[#allocation3 + $0x3f] sm:$0x1] %vm693_vm9, %v1594_v6  ;;  %696 = vst.msk [vmem:[#allocation3 + $0x7f] sm:$0x1] %vm693_vm9, %v1594_v6 }
  0x19   :  { %1497 = vmatprep.subr.bf16.mxu1 %v1597_v60  ;;  %vm679_vm9 = vcmask 1047872  }
  0x1b   :  { %293 = vmatpush1.bf16.msra.mxu0 %v1553_v24  ;;  %1499 = vmatpush3.bf16.msra.mxu1 %v1827_v7 }
  0x1c   :  { %294 = vmatprep.subr.bf16.mxu0 %v1592_v2  ;;  %1500 = vmatprep.subr.bf16.mxu1 %v1597_v60 }
  0x1f   :  { %295 = vmatpush1.bf16.msra.mxu0 %v1554_v25  ;;  %1502 = vmatpush3.bf16.msra.mxu1 %v1837_v10 }
  0x20   :  { %296 = vmatprep.subr.bf16.mxu0 %v1592_v2  ;;  %1503 = vmatprep.subr.bf16.mxu1 %v1597_v60 }
  0x23   :  { %297 = vmatpush1.bf16.msra.mxu0 %v1555_v26  ;;  %1505 = vmatpush3.bf16.msra.mxu1 %v1847_v13 }
  0x24   :  { %298 = vmatprep.subr.bf16.mxu0 %v1592_v2  ;;  %1506 = vmatprep.subr.bf16.mxu1 %v1597_v60 }
  0x27   :  { %299 = vmatpush1.bf16.msra.mxu0 %v1556_v27  ;;  %1508 = vmatpush3.bf16.msra.mxu1 %v1857_v16 }
  0x28   :  { %300 = vmatprep.subr.bf16.mxu0 %v1592_v2  ;;  %1509 = vmatprep.subr.bf16.mxu1 %v1597_v60 }
  0x2b   :  { %301 = vmatpush1.bf16.msra.mxu0 %v1557_v28  ;;  %1511 = vmatpush3.bf16.msra.mxu1 %v1868_v19 }
  0x2c   :  { %302 = vmatprep.subr.bf16.mxu0 %v1592_v2  ;;  %1443 = vmatprep.subr.mxu1 %v1594_v6 }
  0x2f   :  { %303 = vmatpush1.bf16.msra.mxu0 %v1558_v29 }
  0x30   :  { %304 = vmatprep.subr.bf16.mxu0 %v1592_v2 }
  0x33   :  { %305 = vmatpush1.bf16.msra.mxu0 %v1559_v30 }
  0x34   :  { %306 = vmatprep.subr.bf16.mxu0 %v1592_v2 }
  0x37   :  { %307 = vmatpush1.bf16.msra.mxu0 %v278_v32 }
  0x38   :  { %993 = vmatprep.subr.bf16.mxu0 %v1592_v2 }
  0x74   :  { %v100_v33 = vpop.permute.xlu0 %99 }
  0x75   :  { %114 = vst.msk [vmem:[#allocation2 + $0x8] sm:$0xff] %vm113_vm10, %v100_v33 }
  0x76   :  { %v82_v34 = vpop.permute.xlu1 %81 }
  0x77   :  { %94 = vst.msk [vmem:[#allocation2] sm:$0xfe] %vm93_vm11, %v82_v34 }
  0x78   :  { %112 = vst.msk [vmem:[#allocation2] sm:$0xff] %vm111_vm12, %v100_v33  ;;  %v102_v35 = vpop.permute.xlu0 %101 }
  0x79   :  { %116 = vst.msk [vmem:[#allocation2 + $0x18] sm:$0xff] %vm113_vm10, %v102_v35 }
  0x7a   :  { %147 = vst.msk [vmem:[#allocation2 + $0x1f] sm:$0x1] %vm146_vm13, %v1594_v6  ;;  %v84_v36 = vpop.permute.xlu1 %83 }
  0x7b   :  { %96 = vst.msk [vmem:[#allocation2 + $0x10] sm:$0xff] %vm95_vm14, %v84_v36 }
  0x7c   :  { %115 = vst.msk [vmem:[#allocation2 + $0x10] sm:$0xff] %vm111_vm12, %v102_v35  ;;  %v129_v37 = vpop.permute.xlu0 %128 }
  0x7d   :  { %141 = vst.msk [vmem:[#allocation2 + $0x8] sm:$0xff] %vm140_vm15, %v129_v37 }
  0x7e   :  { %v131_v38 = vpop.permute.xlu1 %130 }
  0x7f   :  { %143 = vst.msk [vmem:[#allocation2 + $0x18] sm:$0x7f] %vm142_vm0, %v131_v38  ;;  %v149_v47 = vld [vmem:[#allocation2] sm:$0xff] }
  0x80   :  { %v104_v39 = vpop.permute.xlu0 %103 }
  0x81   :  { %118 = vst.msk [vmem:[#allocation2 + $0x28] sm:$0xff] %vm113_vm10, %v104_v39 }
  0x82   :  { %v106_v40 = vpop.permute.xlu1 %105 }
  0x83   :  { %120 = vst.msk [vmem:[#allocation2 + $0x38] sm:$0xff] %vm113_vm10, %v106_v40  ;;  %v151_v43 = vld [vmem:[#allocation2 + $0x10] sm:$0xff]  ;;  %vm575_vm10 = vcmask 130112  }
  0x84   :  { %148 = vst.msk [vmem:[#allocation2 + $0x3f] sm:$0x1] %vm146_vm13, %v1594_v6  ;;  %v86_v41 = vpop.permute.xlu0 %85  ;;  %v150_v42 = vld [vmem:[#allocation2 + $0x8] sm:$0xff]  ;;  %v157_v49 = vpack.c.bf16 %v151_v43, %v149_v47  ;;  %vm602_vm13 = vcmask 57344  }
  0x85   :  { %97 = vst.msk [vmem:[#allocation2 + $0x20] sm:$0xfe] %vm93_vm11, %v86_v41  ;;  %vm580_vm11 = vcmask 195712  }
  0x86   :  { %117 = vst.msk [vmem:[#allocation2 + $0x20] sm:$0xff] %vm111_vm12, %v104_v39  ;;  %v88_v44 = vpop.permute.xlu1 %87  ;;  %v152_v45 = vld [vmem:[#allocation2 + $0x18] sm:$0xff] }
  0x87   :  { %98 = vst.msk [vmem:[#allocation2 + $0x30] sm:$0xff] %vm95_vm14, %v88_v44  ;;  %v158_v46 = vpack.c.bf16 %v152_v45, %v150_v42  ;;  %vm653_vm14 = vcmask 195584  }
  0x88   :  { %119 = vst.msk [vmem:[#allocation2 + $0x30] sm:$0xff] %vm111_vm12, %v106_v40  ;;  %v133_v48 = vpop.permute.xlu0 %132  ;;  %vm600_vm12 = vcmask 1040448  }
  0x89   :  { %1309 = vmatprep.mubr.msk.bf16.mxu0 %vm269_vm1, %v158_v46  ;;  %144 = vst.msk [vmem:[#allocation2 + $0x28] sm:$0xff] %vm140_vm15, %v133_v48  ;;  %vm691_vm15 = vcmask 1040704  }
  0x8a   :  { %313 = vmatmul.mubr.bf16.vlgmr.msra.gmra.mrb[0].mxu0 %v157_v49  ;;  %v135_v50 = vpop.permute.xlu1 %134  ;;  %576 = vst.msk [vmem:[#allocation3 + $0x8] sm:$0xff] %vm575_vm10, %v1594_v6  ;;  %577 = vst.msk [vmem:[#allocation3 + $0x28] sm:$0xff] %vm575_vm10, %v1594_v6 }
  0x8b   :  { %145 = vst.msk [vmem:[#allocation2 + $0x38] sm:$0x7f] %vm142_vm0, %v135_v50  ;;  %vm683_vm0 = vcmask 1046848  }
  0x8c   :  { %578 = vst.msk [vmem:[#allocation3 + $0x48] sm:$0xff] %vm575_vm10, %v1594_v6  ;;  %579 = vst.msk [vmem:[#allocation3 + $0x68] sm:$0xff] %vm575_vm10, %v1594_v6  ;;  %vm681_vm10 = vcmask 326656  }
  0x8d   :  { %v153_v55 = vld [vmem:[#allocation2 + $0x20] sm:$0xff]  ;;  %581 = vst.msk [vmem:[#allocation3 + $0x8] sm:$0xff] %vm580_vm11, %v1594_v6  ;;  %582 = vst.msk [vmem:[#allocation3 + $0x28] sm:$0xff] %vm580_vm11, %v1594_v6 }
  0x8e   :  { %583 = vst.msk [vmem:[#allocation3 + $0x48] sm:$0xff] %vm580_vm11, %v1594_v6  ;;  %584 = vst.msk [vmem:[#allocation3 + $0x68] sm:$0xff] %vm580_vm11, %v1594_v6  ;;  %vm937_vm11 = vcmask 392192  }
  0x8f   :  { %v155_v52 = vld [vmem:[#allocation2 + $0x30] sm:$0xff]  ;;  %601 = vst.msk [vmem:[#allocation3] sm:$0x1] %vm600_vm12, %v1594_v6  ;;  %604 = vst.msk [vmem:[#allocation3 + $0x40] sm:$0x1] %vm600_vm12, %v1594_v6 }
  0x90   :  { %v154_v51 = vld [vmem:[#allocation2 + $0x28] sm:$0xff]  ;;  %v159_v56 = vpack.c.bf16 %v155_v52, %v153_v55  ;;  %603 = vst.msk [vmem:[#allocation3 + $0x8] sm:$0x1] %vm602_vm13, %v1594_v6  ;;  %605 = vst.msk [vmem:[#allocation3 + $0x48] sm:$0x1] %vm602_vm13, %v1594_v6 }
  0x92   :  { %v156_v53 = vld [vmem:[#allocation2 + $0x38] sm:$0xff] }
  0x93   :  { %v160_v54 = vpack.c.bf16 %v156_v53, %v154_v51  ;;  %v1899_v51 = vld [vmem:[%s2176_s8] sm:$0xff] }
  0x95   :  { %1310 = vmatprep.mubr.msk.bf16.mxu0 %vm269_vm1, %v160_v54  ;;  %vm685_vm1 = vcmask 325632  }
  0x96   :  { %321 = vmatmul.mubr.bf16.gmra.mrb[4].mxu0 %v159_v56 }
 0x15d   :  { %v1873_v20 = vpop.f32.mrb[0].mxu0 }
 0x15e   :  { %v316_v21 = vpop.f32.mrb[1].mxu0  ;;  %v338_v23 = vmul.f32 %v1873_v20, %v1873_v20 }
 0x15f   :  { %v1875_v22 = vpop.f32.mrb[2].mxu0 }
 0x160   :  { %v329_v24 = vadd.f32 %v1875_v22, %v1873_v20  ;;  %v339_v25 = vmul.f32 %v1875_v22, %v1875_v22  ;;  %v319_v26 = vpop.f32.mrb[3].mxu0 }
 0x162   :  { %v342_v27 = vadd.f32 %v339_v25, %v338_v23  ;;  %v1924_v23 = vsub.s32 0, %v1910_v5 }
 0x169   :  { %v1883_v28 = vpop.f32.mrb[4].mxu0 }
 0x16a   :  { %v330_v29 = vadd.f32 %v329_v24, %v1883_v28  ;;  %v340_v30 = vmul.f32 %v1883_v28, %v1883_v28  ;;  %v324_v31 = vpop.f32.mrb[5].mxu0 }
 0x16b   :  { %v1888_v32 = vpop.f32.mrb[6].mxu0  ;;  %v1565_v31 = vld [vmem:[%s2179_s4] sm:$0xff]  }
 0x16c   :  { %v343_v33 = vadd.f32 %v342_v27, %v340_v30  ;;  %v331_v34 = vadd.f32 %v330_v29, %v1888_v32  ;;  %v341_v35 = vmul.f32 %v1888_v32, %v1888_v32  ;;  %v327_v36 = vpop.f32.mrb[7].mxu0  ;;  %v1561_v27 = vld [vmem:[%s2179_s4 + $0x80] sm:$0xff]   ;;  %v1562_v29 = vld [vmem:[%s2179_s4 + $0x88] sm:$0xff]  }
 0x16d   :  { %994 = vmatpush1.bf16.msra.mxu0 %v1561_v27  ;;  %v1563_v30 = vld [vmem:[%s2179_s4 + $0x40] sm:$0xff]   ;;  %v1569_v36 = vld [vmem:[%s2179_s4 + $0x50] sm:$0xff]  }
 0x16e   :  { %v332_v37 = vrot.slane %v331_v34, 4  ;;  %v344_v38 = vadd.f32 %v343_v33, %v341_v35  ;;  %995 = vmatprep.subr.bf16.mxu0 %v1592_v2  ;;  %v1566_v33 = vld [vmem:[%s2179_s4 + $0x48] sm:$0xff]  }
 0x16f   :  { %v1568_v35 = vld [vmem:[%s2179_s4 + $0x8] sm:$0xff]  }
 0x170   :  { %v333_v39 = vadd.f32 %v332_v37, %v331_v34  ;;  %v345_v40 = vrot.slane %v344_v38, 4  ;;  %v1564_v34 = vld [vmem:[%s2179_s4 + $0x90] sm:$0xff]   ;;  %v1567_v37 = vld [vmem:[%s2179_s4 + $0x98] sm:$0xff]  }
 0x171   :  { %996 = vmatpush1.bf16.msra.mxu0 %v1562_v29 }
 0x172   :  { %v334_v41 = vrot.slane %v333_v39, 2  ;;  %v346_v42 = vadd.f32 %v345_v40, %v344_v38  ;;  %997 = vmatprep.subr.bf16.mxu0 %v1592_v2  ;;  %v1571_v38 = vld [vmem:[%s2179_s4 + $0x10] sm:$0xff]   ;;  %v1572_v40 = vld [vmem:[%s2179_s4 + $0x58] sm:$0xff]  }
 0x174   :  { %v335_v43 = vadd.f32 %v334_v41, %v333_v39  ;;  %v347_v44 = vrot.slane %v346_v42, 2  ;;  %v1570_v39 = vld [vmem:[%s2179_s4 + $0xa0] sm:$0xff]   ;;  %v1573_v41 = vld [vmem:[%s2179_s4 + $0xa8] sm:$0xff]  }
 0x175   :  { %998 = vmatpush1.bf16.msra.mxu0 %v1564_v34 }
 0x176   :  { %v336_v45 = vrot.slane %v335_v43, 1  ;;  %v348_v46 = vadd.f32 %v347_v44, %v346_v42  ;;  %999 = vmatprep.subr.bf16.mxu0 %v1592_v2  ;;  %v1574_v42 = vld [vmem:[%s2179_s4 + $0x18] sm:$0xff]   ;;  %v1575_v44 = vld [vmem:[%s2179_s4 + $0x60] sm:$0xff]  }
 0x178   :  { %v349_v47 = vrot.slane %v348_v46, 1  ;;  %v337_v48 = vadd.f32 %v336_v45, %v335_v43  ;;  %v561_v43 = vsub.s32 1, %v1910_v5  ;;  %v1576_v45 = vld [vmem:[%s2179_s4 + $0xb0] sm:$0xff]  }
 0x179   :  { %1000 = vmatpush1.bf16.msra.mxu0 %v1567_v37 }
 0x17a   :  { %v350_v49 = vadd.f32 %v349_v47, %v348_v46  ;;  %1001 = vmatprep.subr.bf16.mxu0 %v1592_v2  ;;  %v1577_v47 = vld [vmem:[%s2179_s4 + $0x20] sm:$0xff]  }
 0x17c   :  { %v351_v50 = vsel %vm74_vm2, %v337_v48, %v350_v49 }
 0x17d   :  { %1441 = vmatmul.mubr.f32.vlgmr.msra.gmra.mrb[0].mxu1 %v351_v50  ;;  %1002 = vmatpush1.bf16.msra.mxu0 %v1570_v39 }
 0x17e   :  { %1445 = vmatprep.mubr.msk.f32.mxu1 %vm1598_vm4, %v1594_v6  ;;  %1444 = vmatpush3.msra.mxu1 %v1899_v51 }
 0x17f   :  { %1361 = vmatprep.subr.bf16.mxu1 %v1563_v30  ;;  %1003 = vmatprep.subr.bf16.mxu0 %v1592_v2 }
 0x181   :  { %1004 = vmatpush1.bf16.msra.mxu0 %v1573_v41 }
 0x182   :  { %1005 = vmatprep.subr.bf16.mxu0 %v1592_v2 }
 0x185   :  { %1006 = vmatpush1.bf16.msra.mxu0 %v1576_v45 }
 0x186   :  { %1007 = vmatprep.subr.bf16.mxu0 %v1592_v2 }
 0x250   :  { %v434_v52 = vpop.f32.mrb[0].mxu1 }
 0x251   :  { %v438_v53 = vmul.f32 0.001953125, %v434_v52  ;;  %v1442_v54 = vpop.f32.mrb[1].mxu1 }
 0x253   :  { %v439_v55 = vmul.f32 %v438_v53, %v438_v53 }
 0x255   :  { %v441_v56 = vrot.slane %v439_v55, 7 }
 0x257   :  { %v443_v57 = vsub.f32 %v438_v53, %v441_v56  ;;  %v1578_v56 = vld [vmem:[%s2179_s4 + $0x68] sm:$0xff]  }
 0x259   :  { %v444_v58 = vmax.f32 %v443_v57, 0.0  ;;  %v1579_v57 = vld [vmem:[%s2179_s4 + $0xb8] sm:$0xff]  }
 0x25a   :  { %1008 = vmatpush1.bf16.msra.mxu0 %v1579_v57 }
 0x25b   :  { %v446_v61 = vadd.f32 1e-05, %v444_v58  ;;  %v1580_v58 = vld [vmem:[%s2179_s4 + $0x28] sm:$0xff]   ;;  %1009 = vmatprep.subr.bf16.mxu0 %v1592_v2 }
 0x25d   :  { %1588 = vrsqrt.f32 %v446_v61 }
 0x25e   :  { %1010 = vmatpush1.bf16.msra.mxu0 %v1582_v1 }
 0x25f   :  { %1011 = vmatprep.subr.bf16.mxu0 %v1592_v2 }
 0x267   :  { %v1589_v9 = vpop.eup %1588 }
 0x268   :  { %v455_v11 = vrot.slane %v1589_v9, %v1913_v8 }
 0x26a   :  { %v456_v12 = vcombine.high %v455_v11, %v455_v11 }
 0x26c   :  { %v463_v15 = vrot.slane %v456_v12, %v1913_v8 }
 0x26e   :  { %v465_v17 = vmul.f32 %v463_v15, %v445_v14  ;;  %v1584_v14 = vld [vmem:[%s2179_s4 + $0x78] sm:$0xff]   ;;  %v1585_v15 = vld [vmem:[%s2179_s4 + $0xc8] sm:$0xff]  }
 0x26f   :  { %1012 = vmatpush1.bf16.msra.mxu0 %v1585_v15 }
 0x270   :  { %v467_v21 = vmul.f32 %v465_v17, %v438_v53  ;;  %1013 = vmatprep.subr.bf16.mxu0 %v1592_v2 }
 0x272   :  { %v468_v24 = vsub.f32 %v466_v18, %v467_v21  ;;  %v1586_v18 = vld [vmem:[%s2179_s4 + $0x38] sm:$0xff]  }
 0x274   :  { %v473_v25 = vrot.slane %v468_v24, %v1924_v23  ;;  %v1587_v24 = vld [vmem:[%s2179_s4 + $0xd0] sm:$0xff]  }
 0x275   :  { %1014 = vmatpush1.bf16.msra.mxu0 %v1587_v24 }
 0x276   :  { %v475_v26 = vsel %vm74_vm2, %v465_v17, %v473_v25 }
 0x277   :  { %1446 = vmatmul.mubr.msk.f32.vlgmr.msra.gmra.mrb[2].mxu1 %vm477_vm5, %v475_v26 }
 0x278   :  { %1362 = vmatpush3.bf16.msra.mxu1 %v1565_v31 }
 0x279   :  { %1363 = vmatprep.subr.bf16.mxu1 %v1566_v33 }
 0x27c   :  { %1364 = vmatpush3.bf16.msra.mxu1 %v1568_v35 }
 0x27d   :  { %1365 = vmatprep.subr.bf16.mxu1 %v1569_v36 }
 0x280   :  { %1366 = vmatpush3.bf16.msra.mxu1 %v1571_v38 }
 0x281   :  { %1367 = vmatprep.subr.bf16.mxu1 %v1572_v40 }
 0x284   :  { %1368 = vmatpush3.bf16.msra.mxu1 %v1574_v42 }
 0x285   :  { %1369 = vmatprep.subr.bf16.mxu1 %v1575_v44 }
 0x288   :  { %1370 = vmatpush3.bf16.msra.mxu1 %v1577_v47 }
 0x289   :  { %1371 = vmatprep.subr.bf16.mxu1 %v1578_v56 }
 0x28c   :  { %1372 = vmatpush3.bf16.msra.mxu1 %v1580_v58 }
 0x28d   :  { %1373 = vmatprep.subr.bf16.mxu1 %v1581_v0 }
 0x290   :  { %1374 = vmatpush3.bf16.msra.mxu1 %v1583_v4 }
 0x291   :  { %1375 = vmatprep.subr.bf16.mxu1 %v1584_v14 }
 0x294   :  { %1376 = vmatpush3.bf16.msra.mxu1 %v1586_v18 }
 0x295   :  { %1512 = vmatprep.subr.bf16.mxu1 %v1597_v60 }
 0x34a   :  { %v547_v46 = vpop.f32.mrb[2].mxu1 }
 0x34b   :  { %v554_v48 = vrot.slane %v547_v46, %v1924_v23  ;;  %v1447_v49 = vpop.f32.mrb[3].mxu1  ;;  %v562_v50 = vrot.slane %v547_v46, %v561_v43 }
 0x34d   :  { %v555_v52 = vmul.f32 %v554_v48, %v1873_v20  ;;  %v556_v53 = vmul.f32 %v554_v48, %v1875_v22  ;;  %v557_v54 = vmul.f32 %v554_v48, %v1883_v28  ;;  %v558_v55 = vmul.f32 %v554_v48, %v1888_v32 }
 0x34f   :  { %v565_v61 = vadd.f32 %v562_v50, %v557_v54  ;;  %v564_v20 = vadd.f32 %v562_v50, %v556_v53  ;;  %v563_v62 = vadd.f32 %v562_v50, %v555_v52  ;;  %v566_v22 = vadd.f32 %v562_v50, %v558_v55 }
 0x351   :  { %v2030_v28 = vmax.f32 %v564_v20, 0.0  ;;  %v2032_v32 = vmax.f32 %v563_v62, 0.0  ;;  %v2048_v9 = vmax.f32 %v565_v61, 0.0  ;;  %v2070_v27 = vmax.f32 %v566_v22, 0.0 }
 0x353   :  { %641 = vrot.lane.b32.xlu1 %v2030_v28, %s1600_s10  ;;  %639 = vrot.lane.b32.xlu0 %v2032_v32, %s1600_s10  ;;  %v662_v11 = vrot.slane %v2030_v28, 1  ;;  %v610_v12 = vrot.slane %v2032_v32, 7  ;;  %v611_v17 = vrot.slane %v2030_v28, 7  ;;  %v613_v21 = vrot.slane %v2048_v9, 7 }
 0x354   :  { %v661_v26 = vrot.slane %v2032_v32, 1  ;;  %v614_v30 = vrot.slane %v2070_v27, 7  ;;  %v664_v31 = vrot.slane %v2048_v9, 1  ;;  %v665_v33 = vrot.slane %v2070_v27, 1 }
 0x355   :  { %v612_v25 = vsel %vm74_vm2, %v610_v12, %v611_v17 }
 0x356   :  { %v663_v29 = vsel %vm121_vm3, %v661_v26, %v662_v11  ;;  %v615_v2 = vsel %vm74_vm2, %v613_v21, %v614_v30  ;;  %v666_v34 = vsel %vm121_vm3, %v664_v31, %v665_v33  ;;  %vm632_vm3 = vcmask 1047616  }
 0x357   :  { %669 = vrot.lane.b32.xlu1 %v662_v11, %s1601_s15  ;;  %616 = vrot.lane.b32.xlu0 %v610_v12, %s1602_s2 }
 0x35b   :  { %620 = vrot.lane.b32.xlu0 %v613_v21, %s1602_s2  ;;  %618 = vrot.lane.b32.xlu1 %v612_v25, %s1602_s2 }
 0x35f   :  { %667 = vrot.lane.b32.xlu0 %v663_v29, %s1601_s15  ;;  %645 = vrot.lane.b32.xlu1 %v2070_v27, %s1600_s10 }
 0x363   :  { %643 = vrot.lane.b32.xlu0 %v2048_v9, %s1600_s10  ;;  %622 = vrot.lane.b32.xlu1 %v615_v2, %s1602_s2 }
 0x367   :  { %671 = vrot.lane.b32.xlu0 %v666_v34, %s1601_s15  ;;  %673 = vrot.lane.b32.xlu1 %v665_v33, %s1601_s15 }
 0x3c5   :  { %v642_v35 = vpop.permute.xlu1 %641  ;;  %v640_v36 = vpop.permute.xlu0 %639 }
 0x3c6   :  { %656 = vst.msk [vmem:[#allocation3 + $0x30] sm:$0xff] %vm653_vm14, %v642_v35  ;;  %654 = vst.msk [vmem:[#allocation3 + $0x10] sm:$0xff] %vm653_vm14, %v640_v36 }
 0x3c7   :  { %692 = vst.msk [vmem:[#allocation3 + $0x37] sm:$0x1] %vm691_vm15, %v1594_v6 }
 0x3c9   :  { %v670_v37 = vpop.permute.xlu1 %669  ;;  %v617_v38 = vpop.permute.xlu0 %616 }
 0x3ca   :  { %684 = vst.msk [vmem:[#allocation3 + $0x30] sm:$0x7f] %vm683_vm0, %v670_v37 }
 0x3cb   :  { %686 = vst.msk [vmem:[#allocation3 + $0x38] sm:$0x7f] %vm685_vm1, %v670_v37 }
 0x3cc   :  { %629 = vst.msk [vmem:[#allocation3] sm:$0xfe] %vm628_vm6, %v617_v38 }
 0x3cd   :  { %631 = vst.msk [vmem:[#allocation3 + $0x8] sm:$0xfe] %vm630_vm7, %v617_v38  ;;  %v621_v39 = vpop.permute.xlu0 %620  ;;  %v619_v40 = vpop.permute.xlu1 %618 }
 0x3ce   :  { %652 = vst.msk [vmem:[#allocation3 + $0x8] sm:$0xff] %vm651_vm8, %v640_v36 }
 0x3cf   :  { %635 = vst.msk [vmem:[#allocation3 + $0x40] sm:$0xfe] %vm628_vm6, %v621_v39 }
 0x3d0   :  { %636 = vst.msk [vmem:[#allocation3 + $0x48] sm:$0xfe] %vm630_vm7, %v621_v39 }
 0x3d1   :  { %633 = vst.msk [vmem:[#allocation3 + $0x20] sm:$0xff] %vm632_vm3, %v619_v40  ;;  %v668_v41 = vpop.permute.xlu0 %667  ;;  %v646_v42 = vpop.permute.xlu1 %645  ;;  %v703_v58 = vld [vmem:[#allocation3 + $0x30] sm:$0xff] }
 0x3d2   :  { %634 = vst.msk [vmem:[#allocation3 + $0x28] sm:$0xff] %vm477_vm5, %v619_v40  ;;  %v704_v53 = vld [vmem:[#allocation3 + $0x38] sm:$0xff] }
 0x3d3   :  { %655 = vst.msk [vmem:[#allocation3 + $0x28] sm:$0xff] %vm651_vm8, %v642_v35  ;;  %v697_v50 = vld [vmem:[#allocation3] sm:$0xff] }
 0x3d4   :  { %680 = vst.msk [vmem:[#allocation3 + $0x10] sm:$0xff] %vm679_vm9, %v668_v41 }
 0x3d5   :  { %682 = vst.msk [vmem:[#allocation3 + $0x18] sm:$0xff] %vm681_vm10, %v668_v41  ;;  %v644_v44 = vpop.permute.xlu0 %643  ;;  %v623_v45 = vpop.permute.xlu1 %622  ;;  %v698_v47 = vld [vmem:[#allocation3 + $0x8] sm:$0xff] }
 0x3d6   :  { %660 = vst.msk [vmem:[#allocation3 + $0x70] sm:$0xff] %vm653_vm14, %v646_v42  ;;  %658 = vst.msk [vmem:[#allocation3 + $0x50] sm:$0xff] %vm653_vm14, %v644_v44  ;;  %v705_v4 = vld [vmem:[#allocation3 + $0x40] sm:$0xff] }
 0x3d7   :  { %695 = vst.msk [vmem:[#allocation3 + $0x77] sm:$0x1] %vm691_vm15, %v1594_v6 }
 0x3d8   :  { %v701_v46 = vld [vmem:[#allocation3 + $0x20] sm:$0xff]  ;;  %657 = vst.msk [vmem:[#allocation3 + $0x48] sm:$0xff] %vm651_vm8, %v644_v44 }
 0x3d9   :  { %637 = vst.msk [vmem:[#allocation3 + $0x60] sm:$0xff] %vm632_vm3, %v623_v45  ;;  %v713_v52 = vpack.c.bf16 %v701_v46, %v697_v50  ;;  %v672_v54 = vpop.permute.xlu0 %671  ;;  %v674_v55 = vpop.permute.xlu1 %673 }
 0x3da   :  { %638 = vst.msk [vmem:[#allocation3 + $0x68] sm:$0xff] %vm477_vm5, %v623_v45  ;;  %v702_v48 = vld [vmem:[#allocation3 + $0x28] sm:$0xff] }
 0x3db   :  { %659 = vst.msk [vmem:[#allocation3 + $0x68] sm:$0xff] %vm651_vm8, %v646_v42  ;;  %v714_v49 = vpack.c.bf16 %v702_v48, %v698_v47  ;;  %v699_v57 = vld [vmem:[#allocation3 + $0x10] sm:$0xff] }
 0x3dc   :  { %v700_v56 = vld [vmem:[#allocation3 + $0x18] sm:$0xff]  ;;  %687 = vst.msk [vmem:[#allocation3 + $0x50] sm:$0xff] %vm679_vm9, %v672_v54  ;;  %v715_v20 = vpack.c.bf16 %v703_v58, %v699_v57 }
 0x3dd   :  { %976 = vmatprep.mubr.bf16.mxu1 %v714_v49  ;;  %688 = vst.msk [vmem:[#allocation3 + $0x58] sm:$0xff] %vm681_vm10, %v672_v54  ;;  %v716_v61 = vpack.c.bf16 %v704_v53, %v700_v56 }
 0x3de   :  { %689 = vst.msk [vmem:[#allocation3 + $0x70] sm:$0x7f] %vm683_vm0, %v674_v55  ;;  %977 = vmatmul.mubr.bf16.vlgmr.msra.gmra.mrb[4].mxu1 %v713_v52 }
 0x3df   :  { %690 = vst.msk [vmem:[#allocation3 + $0x78] sm:$0x7f] %vm685_vm1, %v674_v55  ;;  %1514 = vmatpush3.bf16.msra.mxu1 %v1796_v59  ;;  %1339 = vmatprep.mubr.msk.bf16.mxu0 %vm937_vm11, %v716_v61  ;;  %v706_v62 = vld [vmem:[#allocation3 + $0x48] sm:$0xff] }
 0x3e0   :  { %1515 = vmatprep.subr.bf16.mxu1 %v1597_v60  ;;  %1026 = vmatmul.mubr.bf16.vlgmr.msra.gmra.mrb[8].mxu0 %v715_v20  ;;  %v709_v22 = vld [vmem:[#allocation3 + $0x60] sm:$0xff] }
 0x3e1   :  { %v717_v11 = vpack.c.bf16 %v709_v22, %v705_v4 }
 0x3e2   :  { %v710_v0 = vld [vmem:[#allocation3 + $0x68] sm:$0xff] }
 0x3e3   :  { %v718_v1 = vpack.c.bf16 %v710_v0, %v706_v62  ;;  %1517 = vmatpush3.bf16.msra.mxu1 %v1807_v63  ;;  %v707_v15 = vld [vmem:[#allocation3 + $0x50] sm:$0xff] }
 0x3e4   :  { %1518 = vmatprep.subr.bf16.mxu1 %v1597_v60  ;;  %v708_v12 = vld [vmem:[#allocation3 + $0x58] sm:$0xff] }
 0x3e5   :  { %984 = vmatprep.mubr.bf16.mxu1 %v718_v1  ;;  %v711_v17 = vld [vmem:[#allocation3 + $0x70] sm:$0xff] }
 0x3e6   :  { %v712_v14 = vld [vmem:[#allocation3 + $0x78] sm:$0xff]  ;;  %985 = vmatmul.mubr.bf16.gmra.mrb[8].mxu1 %v717_v11  ;;  %v719_v18 = vpack.c.bf16 %v711_v17, %v707_v15 }
 0x3e7   :  { %v720_v59 = vpack.c.bf16 %v712_v14, %v708_v12  ;;  %1520 = vmatpush3.bf16.msra.mxu1 %v1817_v3  ;;  %1480 = vmatprep.mubr.msk.f32.mxu1 %vm1598_vm4, %v1594_v6 }
 0x3e8   :  { %1521 = vmatprep.subr.bf16.mxu1 %v1597_v60 }
 0x3e9   :  { %1340 = vmatprep.mubr.msk.bf16.mxu0 %vm937_vm11, %v720_v59 }
 0x3ea   :  { %1034 = vmatmul.mubr.bf16.gmra.mrb[12].mxu0 %v719_v18 }
 0x3eb   :  { %1523 = vmatpush3.bf16.msra.mxu1 %v1827_v7 }
 0x3ec   :  { %1524 = vmatprep.subr.bf16.mxu1 %v1597_v60 }
 0x3ef   :  { %1526 = vmatpush3.bf16.msra.mxu1 %v1837_v10 }
 0x3f0   :  { %1527 = vmatprep.subr.bf16.mxu1 %v1597_v60 }
 0x3f3   :  { %1529 = vmatpush3.bf16.msra.mxu1 %v1847_v13 }
 0x3f4   :  { %1530 = vmatprep.subr.bf16.mxu1 %v1597_v60 }
 0x3f7   :  { %1532 = vmatpush3.bf16.msra.mxu1 %v1857_v16 }
 0x3f8   :  { %1533 = vmatprep.subr.bf16.mxu1 %v1597_v60 }
 0x3fb   :  { %1535 = vmatpush3.bf16.msra.mxu1 %v1868_v19 }
 0x3fc   :  { %1483 = vmatprep.subr.mxu1 %v1594_v6 }
 0x4b1   :  { %v1377_v63 = vpop.f32.mrb[4].mxu1 }
 0x4b2   :  { %v1378_v3 = vpop.f32.mrb[5].mxu1 }
 0x4b3   :  { %v1379_v7 = vadd.f32 %v1378_v3, %v1377_v63  ;;  %v1380_v21 = vpop.f32.mrb[6].mxu1  ;;  %v1027_v10 = vpop.f32.mrb[8].mxu0 }
 0x4b4   :  { %v1381_v24 = vpop.f32.mrb[7].mxu1  ;;  %v1029_v13 = vpop.f32.mrb[9].mxu0 }
 0x4b5   :  { %v1382_v25 = vadd.f32 %v1381_v24, %v1380_v21  ;;  %v2127_v26 = vadd.f32 %v1379_v7, %v1027_v10  ;;  %v1030_v29 = vpop.f32.mrb[10].mxu0  ;;  %v1179_v10 = vld [vmem:[%s2181_s6] sm:$0x1] }
 0x4b6   :  { %v1032_v16 = vpop.f32.mrb[11].mxu0 }
 0x4b7   :  { %v2129_v30 = vadd.f32 %v1382_v25, %v1030_v29  ;;  %v1051_v36 = vmul.f32 %v2127_v26, %v2127_v26 }
 0x4b9   :  { %v1383_v2 = vpop.f32.mrb[8].mxu1  ;;  %v1052_v19 = vmul.f32 %v2129_v30, %v2129_v30  ;;  %v1042_v37 = vadd.f32 %v2129_v30, %v2127_v26 }
 0x4ba   :  { %v1384_v60 = vpop.f32.mrb[9].mxu1 }
 0x4bb   :  { %v1385_v31 = vadd.f32 %v1384_v60, %v1383_v2  ;;  %v1386_v33 = vpop.f32.mrb[10].mxu1  ;;  %v1055_v42 = vadd.f32 %v1052_v19, %v1051_v36 }
 0x4bc   :  { %v1387_v34 = vpop.f32.mrb[11].mxu1 }
 0x4bd   :  { %v1035_v35 = vpop.f32.mrb[12].mxu0  ;;  %v1388_v38 = vadd.f32 %v1387_v34, %v1386_v33 }
 0x4be   :  { %v1036_v39 = vadd.f32 %v1385_v31, %v1035_v35  ;;  %v1037_v40 = vpop.f32.mrb[13].mxu0 }
 0x4bf   :  { %v1038_v41 = vpop.f32.mrb[14].mxu0 }
 0x4c0   :  { %v1043_v44 = vadd.f32 %v1042_v37, %v1036_v39  ;;  %v1053_v45 = vmul.f32 %v1036_v39, %v1036_v39  ;;  %v1039_v46 = vadd.f32 %v1388_v38, %v1038_v41  ;;  %v1040_v47 = vpop.f32.mrb[15].mxu0 }
 0x4c2   :  { %v1056_v48 = vadd.f32 %v1055_v42, %v1053_v45  ;;  %v1044_v49 = vadd.f32 %v1043_v44, %v1039_v46  ;;  %v1054_v50 = vmul.f32 %v1039_v46, %v1039_v46 }
 0x4c4   :  { %v1045_v52 = vrot.slane %v1044_v49, 4  ;;  %v1057_v53 = vadd.f32 %v1056_v48, %v1054_v50 }
 0x4c6   :  { %v1046_v54 = vadd.f32 %v1045_v52, %v1044_v49  ;;  %v1058_v55 = vrot.slane %v1057_v53, 4 }
 0x4c8   :  { %v1047_v56 = vrot.slane %v1046_v54, 2  ;;  %v1059_v57 = vadd.f32 %v1058_v55, %v1057_v53 }
 0x4ca   :  { %v1048_v58 = vadd.f32 %v1047_v56, %v1046_v54  ;;  %v1060_v61 = vrot.slane %v1059_v57, 2 }
 0x4cc   :  { %v1049_v20 = vrot.slane %v1048_v58, 1  ;;  %v1061_v62 = vadd.f32 %v1060_v61, %v1059_v57 }
 0x4ce   :  { %v1062_v22 = vrot.slane %v1061_v62, 1  ;;  %v1050_v0 = vadd.f32 %v1049_v20, %v1048_v58 }
 0x4d0   :  { %v1063_v1 = vadd.f32 %v1062_v22, %v1061_v62 }
 0x4d2   :  { %v1064_v4 = vsel %vm74_vm2, %v1050_v0, %v1063_v1 }
 0x4d3   :  { %1481 = vmatmul.mubr.f32.vlgmr.msra.gmra.mrb[12].mxu1 %v1064_v4 }
 0x4d4   :  { %1484 = vmatpush3.msra.mxu1 %v1899_v51  ;;  %1485 = vmatprep.mubr.msk.f32.mxu1 %vm1598_vm4, %v1594_v6  ;;  %v1158_v51 = vld [vmem:[%s2180_s5] sm:$0x1] }
 0x5a6   :  { %v1147_v11 = vpop.f32.mrb[12].mxu1 }
 0x5a7   :  { %v1151_v12 = vmul.f32 0.001953125, %v1147_v11  ;;  %v1482_v14 = vpop.f32.mrb[13].mxu1 }
 0x5a9   :  { %v1152_v15 = vmul.f32 %v1151_v12, %v1151_v12 }
 0x5ab   :  { %v1154_v59 = vrot.slane %v1152_v15, 7 }
 0x5ad   :  { %v1156_v17 = vsub.f32 %v1151_v12, %v1154_v59 }
 0x5af   :  { %v1157_v18 = vmax.f32 %v1156_v17, 0.0 }
 0x5b1   :  { %v1159_v63 = vadd.f32 1e-05, %v1157_v18 }
 0x5b3   :  { %1590 = vrsqrt.f32 %v1159_v63 }
 0x5bd   :  { %v1591_v3 = vpop.eup %1590 }
 0x5be   :  { %v1168_v7 = vrot.slane %v1591_v3, %v1913_v8 }
 0x5c0   :  { %v1169_v21 = vcombine.high %v1168_v7, %v1168_v7 }
 0x5c2   :  { %v1176_v24 = vrot.slane %v1169_v21, %v1913_v8 }
 0x5c4   :  { %v1178_v6 = vmul.f32 %v1176_v24, %v1158_v51 }
 0x5c6   :  { %v1180_v25 = vmul.f32 %v1178_v6, %v1151_v12 }
 0x5c8   :  { %v1181_v13 = vsub.f32 %v1179_v10, %v1180_v25 }
 0x5ca   :  { %v1186_v29 = vrot.slane %v1181_v13, %v1924_v23 }
 0x5cc   :  { %v1188_v16 = vsel %vm74_vm2, %v1178_v6, %v1186_v29 }
 0x5cd   :  { %1486 = vmatmul.mubr.msk.f32.vlgmr.msra.gmra.mrb[14].mxu1 %vm477_vm5, %v1188_v16 }
 0x6a0   :  { %v1259_v2 = vpop.f32.mrb[14].mxu1 }
 0x6a1   :  { %v1266_v60 = vrot.slane %v1259_v2, %v1924_v23  ;;  %v1487_v19 = vpop.f32.mrb[15].mxu1  ;;  %v1274_v8 = vrot.slane %v1259_v2, %v561_v43 }
 0x6a3   :  { %v1267_v31 = vmul.f32 %v1266_v60, %v2127_v26  ;;  %v1268_v33 = vmul.f32 %v1266_v60, %v2129_v30  ;;  %v1269_v34 = vmul.f32 %v1266_v60, %v1036_v39  ;;  %v1270_v35 = vmul.f32 %v1266_v60, %v1039_v46 }
 0x6a5   :  { %v1275_v36 = vadd.f32 %v1274_v8, %v1267_v31  ;;  %v1276_v37 = vadd.f32 %v1274_v8, %v1268_v33  ;;  %v1277_v38 = vadd.f32 %v1274_v8, %v1269_v34  ;;  %v1278_v40 = vadd.f32 %v1274_v8, %v1270_v35 }
 0x6a7   :  { %v1279_v41 = vmax.f32 %v1275_v36, 0.0  ;;  %v1280_v42 = vmax.f32 %v1276_v37, 0.0  ;;  %v1281_v44 = vmax.f32 %v1277_v38, 0.0  ;;  %v1282_v45 = vmax.f32 %v1278_v40, 0.0 }
 0x6a9   :  { %v1283_v23 = vadd.f32 %v1279_v41, %v2032_v32  ;;  %v1284_v47 = vadd.f32 %v1280_v42, %v2030_v28  ;;  %v1285_v5 = vadd.f32 %v1281_v44, %v2048_v9  ;;  %v1286_v43 = vadd.f32 %v1282_v45, %v2070_v27 }
 0x6ab   :  { %1287 = vst [vmem:[%s2182_s9] sm:$0xff] %v1283_v23  ;;  %1288 = vst [vmem:[%s2182_s9 + $0x8] sm:$0xff] %v1284_v47 }
 0x6ac   :  { %1289 = vst [vmem:[%s2182_s9 + $0x10] sm:$0xff] %v1285_v5  ;;  %1290 = vst [vmem:[%s2182_s9 + $0x18] sm:$0xff] %v1286_v43 }

</bundles_post_ra>
